<compile_context>
chip_gen: v6e
topology: v6e:2x2x1
jax: 0.10.0
libtpu: 0.0.40
codegen_flags: <defaults>
</compile_context>

<pallas_src>
import functools

import jax
import jax.numpy as jnp
from jax.experimental import pallas as pl
from jax.experimental.pallas import tpu as pltpu


LANE = 128      # TPU lane width — feature dims are padded to multiples of this
SUBLANE = 8
# Node-row tile for the A_hat aggregation. 128 is safe on every generation
# (matches v5e's 4x128 MXU); bump to 256 on v7x, 512-1024 on v6e for large N.
TILE_M = 128

_VMEM_LIMIT = 32 * 1024 * 1024   # conservative: fits v5e/v6e/v7x scoped VMEM


def _round_up(n, m):
    return ((n + m - 1) // m) * m


def _pad2d(a, rows, cols):
    r, c = a.shape
    if r == rows and c == cols:
        return a
    return jnp.pad(a, ((0, rows - r), (0, cols - c)))


# ----------------------------- Pallas kernels ------------------------------ #

def gcn_tower_kernel(a_ref, x_ref, w1_ref, b1_ref, w2_ref, b2_ref, p_ref,
                     z_ref, g_ref, tmp_ref, z1_ref, gacc_ref):
    """Fused 2-layer GCN + mean pool for one augmented view.

    grid = (2, N_pad // TILE_M): axis 0 = GCN layer, axis 1 = node-row tile.
    Per layer, the (lane-dense) feature transform H_{l-1} @ W_l is computed
    once (at row tile 0) into VMEM scratch; each row tile then does the
    O(N^2)-cost aggregation  relu(A[rows] @ (H_{l-1} @ W_l) + b_l)  on the MXU.
    """
    layer = pl.program_id(0)
    i = pl.program_id(1)
    tm = z_ref.shape[0]

    # ---- layer-0 prologue: XW1 = ((1-p) X) @ W1 (aug scale folded into W1) --
    @pl.when(jnp.logical_and(layer == 0, i == 0))
    def _():
        tmp_ref[...] = jnp.dot(
            x_ref[...], w1_ref[...],
            preferred_element_type=jnp.float32).astype(jnp.bfloat16)

    # ---- layer-1 prologue: ZW2 = Z1 @ W2, reset pool accumulator -----------
    @pl.when(jnp.logical_and(layer == 1, i == 0))
    def _():
        tmp_ref[...] = jnp.dot(
            z1_ref[...].astype(jnp.bfloat16), w2_ref[...],
            preferred_element_type=jnp.float32).astype(jnp.bfloat16)
        gacc_ref[...] = jnp.zeros_like(gacc_ref)

    # ---- aggregation for this row tile (bf16 MXU, f32 accumulate/epilogue) --
    is_l0 = (layer == 0).astype(jnp.float32)
    bias = is_l0 * b1_ref[...] + (1.0 - is_l0) * b2_ref[...]
    rows = jnp.maximum(
        jnp.dot(a_ref[...], tmp_ref[...],
                preferred_element_type=jnp.float32) + bias, 0.0)

    # stash layer-1 input (Z1) rows in VMEM — never round-trips through HBM
    @pl.when(layer == 0)
    def _():
        r0 = pl.multiple_of(i * tm, tm)
        z1_ref[pl.ds(r0, tm), :] = rows

    # node embeddings: layer-0 write is overwritten by layer 1 -> final Z2
    z_ref[...] = rows

    # graph readout: accumulate P[:, rows_i] @ Z2[rows_i]
    @pl.when(layer == 1)
    def _():
        gacc_ref[...] += jnp.dot(p_ref[...], rows,
                                 preferred_element_type=jnp.float32)

    @pl.when(jnp.logical_and(layer == 1, i == pl.num_programs(1) - 1))
    def _():
        g_ref[...] = gacc_ref[...]


def mlp_kernel(x_ref, w1_ref, b1_ref, w2_ref, b2_ref, o_ref):
    """Projection head: (relu(X @ W1 + b1)) @ W2 + b2, fused, per row tile."""
    h = jnp.dot(x_ref[...], w1_ref[...], preferred_element_type=jnp.float32)
    h = jnp.maximum(h + b1_ref[...], 0.0)
    o_ref[...] = jnp.dot(h.astype(jnp.bfloat16), w2_ref[...],
                         preferred_element_type=jnp.float32) + b2_ref[...]


# ----------------------------- kernel wrappers ------------------------------ #

def pallas_gcn_tower(a_hat, x, w1, b1, w2, b2, pool_mat, *, tile_m=TILE_M):
    """One fused GCN tower: Z = GCN2(GCN1(X)), G = P @ Z."""
    n_pad = a_hat.shape[0]
    f_pad = x.shape[1]
    h = w1.shape[1]
    g_pad = pool_mat.shape[0]
    nt = n_pad // tile_m

    flops = 2 * (n_pad * f_pad * h + n_pad * h * h
                 + 2 * n_pad * n_pad * h + g_pad * n_pad * h)
    bytes_accessed = (2 * a_hat.size * a_hat.dtype.itemsize        # A read/layer
                      + x.size * x.dtype.itemsize
                      + (w1.size + w2.size) * 2
                      + (b1.size + b2.size) * 4
                      + pool_mat.size * 4
                      + n_pad * h * 4 + g_pad * h * 4)

    return pl.pallas_call(
        gcn_tower_kernel,
        out_shape=(jax.ShapeDtypeStruct((n_pad, h), jnp.float32),
                   jax.ShapeDtypeStruct((g_pad, h), jnp.float32)),
        grid_spec=pltpu.PrefetchScalarGridSpec(
            num_scalar_prefetch=0,
            grid=(2, nt),                                     # (layer, row tile)
            in_specs=[
                pl.BlockSpec((tile_m, n_pad), lambda l, i: (i, 0)),   # A rows
                pl.BlockSpec((n_pad, f_pad), lambda l, i: (0, 0)),    # X (resident)
                pl.BlockSpec((f_pad, h), lambda l, i: (0, 0)),        # W1 (scaled)
                pl.BlockSpec((1, h), lambda l, i: (0, 0)),            # b1
                pl.BlockSpec((h, h), lambda l, i: (0, 0)),            # W2
                pl.BlockSpec((1, h), lambda l, i: (0, 0)),            # b2
                pl.BlockSpec((g_pad, tile_m), lambda l, i: (0, i)),   # pool tile
            ],
            out_specs=[
                pl.BlockSpec((tile_m, h), lambda l, i: (i, 0)),       # Z (nodes)
                pl.BlockSpec((g_pad, h), lambda l, i: (0, 0)),        # G (graphs)
            ],
            scratch_shapes=[
                pltpu.VMEM((n_pad, h), jnp.bfloat16),   # XW1 / ZW2
                pltpu.VMEM((n_pad, h), jnp.float32),    # Z1
                pltpu.VMEM((g_pad, h), jnp.float32),    # pool accumulator
            ]),
        compiler_params=pltpu.CompilerParams(
            dimension_semantics=("arbitrary", "arbitrary"),
            vmem_limit_bytes=_VMEM_LIMIT),
        cost_estimate=pl.CostEstimate(flops=flops, transcendentals=0,
                                      bytes_accessed=bytes_accessed),
    )(a_hat, x, w1, b1, w2, b2, pool_mat)


def pallas_mlp(x, w1, b1, w2, b2, *, tile_m=TILE_M):
    """Fused 2-layer projection head, row-tiled ('parallel' -> v7x megacore)."""
    rows, fin = x.shape
    mid = w1.shape[1]
    out = w2.shape[1]
    tm = tile_m if rows % tile_m == 0 else rows

    flops = 2 * rows * (fin * mid + mid * out)
    bytes_accessed = (x.size * x.dtype.itemsize + (w1.size + w2.size) * 2
                      + (b1.size + b2.size) * 4 + rows * out * 4)

    return pl.pallas_call(
        mlp_kernel,
        out_shape=jax.ShapeDtypeStruct((rows, out), jnp.float32),
        grid_spec=pltpu.PrefetchScalarGridSpec(
            num_scalar_prefetch=0,
            grid=(rows // tm,),
            in_specs=[
                pl.BlockSpec((tm, fin), lambda r: (r, 0)),
                pl.BlockSpec((fin, mid), lambda r: (0, 0)),
                pl.BlockSpec((1, mid), lambda r: (0, 0)),
                pl.BlockSpec((mid, out), lambda r: (0, 0)),
                pl.BlockSpec((1, out), lambda r: (0, 0)),
            ],
            out_specs=pl.BlockSpec((tm, out), lambda r: (r, 0))),
        compiler_params=pltpu.CompilerParams(
            dimension_semantics=("parallel",),
            vmem_limit_bytes=_VMEM_LIMIT),
        cost_estimate=pl.CostEstimate(flops=flops, transcendentals=0,
                                      bytes_accessed=bytes_accessed),
    )(x, w1, b1, w2, b2)


# ------------------------------ glue (plain JAX) ---------------------------- #

def normalized_adjacency(edge_index, num_nodes):
    """A_hat = D^{-1/2} (A + I) D^{-1/2}, dense (glue, computed once)."""
    src, dst = edge_index[0], edge_index[1]
    a = jnp.zeros((num_nodes, num_nodes), jnp.float32)
    a = a.at[src, dst].set(1.0)
    a = a.at[dst, src].set(1.0)                       # symmetrize
    a = a + jnp.eye(num_nodes, dtype=jnp.float32)     # self loops
    deg = jnp.sum(a, axis=1)
    d_inv_sqrt = 1.0 / jnp.sqrt(jnp.maximum(deg, 1e-12))
    return a * d_inv_sqrt[:, None] * d_inv_sqrt[None, :]


def mean_pool_matrix(batch, num_graphs):
    """P[g, n] = 1/|graph g| if node n belongs to graph g."""
    onehot = (batch[None, :] == jnp.arange(num_graphs)[:, None]).astype(jnp.float32)
    counts = jnp.maximum(jnp.sum(onehot, axis=1, keepdims=True), 1.0)
    return onehot / counts


def prepare_graph_inputs(x, edge_index, batch, num_nodes, num_graphs,
                         *, tile_m=TILE_M):
    """Hoisted, once-per-batch preprocessing: A_hat, pool matrix, padding."""
    a_hat = normalized_adjacency(edge_index, num_nodes)
    pool = mean_pool_matrix(batch, num_graphs)
    n_pad = _round_up(num_nodes, tile_m)
    g_pad = _round_up(num_graphs, SUBLANE)
    f_pad = _round_up(x.shape[1], LANE)
    a_hat_p = _pad2d(a_hat, n_pad, n_pad).astype(jnp.bfloat16)
    pool_p = _pad2d(pool, g_pad, n_pad)                        # keep f32
    x_p = _pad2d(x, n_pad, f_pad).astype(jnp.bfloat16)
    return a_hat_p, pool_p, x_p


def init_params(key, in_feat, hidden, proj):
    ks = jax.random.split(key, 8)

    def lin(k, fi, fo):
        scale = 1.0 / jnp.sqrt(jnp.float32(fi))
        return (jax.random.uniform(k, (fi, fo), jnp.float32, -scale, scale),
                jnp.zeros((1, fo), jnp.float32))

    p = {}
    # two GCN towers, two layers each
    p["gcn1_w1"], p["gcn1_b1"] = lin(ks[0], in_feat, hidden)
    p["gcn1_w2"], p["gcn1_b2"] = lin(ks[1], hidden, hidden)
    p["gcn2_w1"], p["gcn2_b1"] = lin(ks[2], in_feat, hidden)
    p["gcn2_w2"], p["gcn2_b2"] = lin(ks[3], hidden, hidden)
    # node projection head (mlp1) and graph projection head (mlp2)
    p["mlp1_w1"], p["mlp1_b1"] = lin(ks[4], hidden, hidden)
    p["mlp1_w2"], p["mlp1_b2"] = lin(ks[5], hidden, proj)
    p["mlp2_w1"], p["mlp2_b1"] = lin(ks[6], hidden, hidden)
    p["mlp2_w2"], p["mlp2_b2"] = lin(ks[7], hidden, proj)
    return p


def prepare_params(params, in_feat, hidden, proj):
    """Zero-pad the first-layer GCN weights to a lane-dense input dim (exact)."""
    assert hidden % LANE == 0 and proj % LANE == 0, \
        "hidden/proj must be multiples of 128 for lane-dense outputs"
    f_pad = _round_up(in_feat, LANE)
    p = dict(params)
    for k in ("gcn1_w1", "gcn2_w1"):
        w = params[k]
        p[k] = _pad2d(w, f_pad, w.shape[1])
    return p


@functools.partial(jax.jit, static_argnames=("num_nodes", "num_graphs"))
def encoder_forward(params, x_pad, a_hat, pool_mat, ptb_prob1, ptb_prob2,
                    *, num_nodes, num_graphs):
    bf16 = jnp.bfloat16

    # Augmentation (expected-value feature masking) folded exactly into W1:
    # ((1-p) X) @ W1 == X @ ((1-p) W1). No aug kernels / extra HBM traffic.
    w1_t1 = ((1.0 - ptb_prob1) * params["gcn1_w1"]).astype(bf16)
    w1_t2 = ((1.0 - ptb_prob2) * params["gcn2_w1"]).astype(bf16)

    z1, g1 = pallas_gcn_tower(a_hat, x_pad, w1_t1, params["gcn1_b1"],
                              params["gcn1_w2"].astype(bf16),
                              params["gcn1_b2"], pool_mat)
    z2, g2 = pallas_gcn_tower(a_hat, x_pad, w1_t2, params["gcn2_b1"],
                              params["gcn2_w2"].astype(bf16),
                              params["gcn2_b2"], pool_mat)

    n_pad = z1.shape[0]
    g_pad = g1.shape[0]

    # Shared-weight projection heads, batched across the two views.
    h = pallas_mlp(jnp.concatenate([z1, z2], axis=0).astype(bf16),
                   params["mlp1_w1"].astype(bf16), params["mlp1_b1"],
                   params["mlp1_w2"].astype(bf16), params["mlp1_b2"])
    g = pallas_mlp(jnp.concatenate([g1, g2], axis=0).astype(bf16),
                   params["mlp2_w1"].astype(bf16), params["mlp2_b1"],
                   params["mlp2_w2"].astype(bf16), params["mlp2_b2"])

    h1 = h[:num_nodes]
    h2 = h[n_pad:n_pad + num_nodes]
    g1o = g[:num_graphs]
    g2o = g[g_pad:g_pad + num_graphs]
    return h1, h2, g1o, g2o


# --------------------------------- driver ----------------------------------- #

if __name__ == "__main__":
    key = jax.random.PRNGKey(0)
    k_x, k_p = jax.random.split(key)

    # small synthetic graph batch: 2 graphs, 8 nodes each
    num_graphs = 2
    nodes_per_graph = 8
    num_nodes = num_graphs * nodes_per_graph
    in_feat, hidden, proj = 8, 128, 128      # hidden/proj lane-dense (128)

    x = jax.random.normal(k_x, (num_nodes, in_feat), jnp.float32)

    # ring edges inside each graph (deterministic)
    src, dst = [], []
    for g in range(num_graphs):
        base = g * nodes_per_graph
        for i in range(nodes_per_graph):
            src.append(base + i)
            dst.append(base + (i + 1) % nodes_per_graph)
    edge_index = jnp.array([src, dst], dtype=jnp.int32)            # [2, 16]
    batch = jnp.repeat(jnp.arange(num_graphs, dtype=jnp.int32),
                       nodes_per_graph)                             # [16]

    ptb_prob1 = 0.3   # data.max  (augmentation 1 perturbation prob)
    ptb_prob2 = 0.1   # data.min  (augmentation 2 perturbation prob)

    params = prepare_params(init_params(k_p, in_feat, hidden, proj),
                            in_feat, hidden, proj)
    # hoisted once-per-batch graph-structure preprocessing
    a_hat, pool_mat, x_pad = prepare_graph_inputs(
        x, edge_index, batch, num_nodes, num_graphs)

    h1, h2, g1, g2 = encoder_forward(
        params, x_pad, a_hat, pool_mat, ptb_prob1, ptb_prob2,
        num_nodes=num_nodes, num_graphs=num_graphs)
    jax.block_until_ready((h1, h2, g1, g2))

    assert h1.shape == (num_nodes, proj) and h2.shape == (num_nodes, proj)
    assert g1.shape == (num_graphs, proj) and g2.shape == (num_graphs, proj)
    print("KERNEL_OK")
</pallas_src>

<mosaic_0001>
module attributes {stable_mosaic.version = 11 : i64} {
  func.func @gcn_tower_kernel(%arg0: i32, %arg1: i32, %arg2: memref<128x128xbf16, #tpu.memory_space<vmem>>, %arg3: memref<128x128xbf16, #tpu.memory_space<vmem>>, %arg4: memref<128x128xbf16, #tpu.memory_space<vmem>>, %arg5: memref<1x128xf32, #tpu.memory_space<vmem>>, %arg6: memref<128x128xbf16, #tpu.memory_space<vmem>>, %arg7: memref<1x128xf32, #tpu.memory_space<vmem>>, %arg8: memref<8x128xf32, #tpu.memory_space<vmem>>, %arg9: memref<128x128xf32, #tpu.memory_space<vmem>>, %arg10: memref<8x128xf32, #tpu.memory_space<vmem>>, %arg11: memref<128x128xbf16, #tpu.memory_space<vmem>>, %arg12: memref<128x128xf32, #tpu.memory_space<vmem>>, %arg13: memref<8x128xf32, #tpu.memory_space<vmem>>) attributes {dimension_semantics = [#tpu.dimension_semantics<arbitrary>, #tpu.dimension_semantics<arbitrary>], iteration_bounds = array<i64: 2, 1>, scalar_prefetch = 0 : i64, scratch_operands = 3 : i64, tpu.core_type = #tpu.core_type<tc>, window_params = [{transform_indices = @transform_0, window_bounds = array<i64: 128, 128>}, {pipeline_mode = #tpu.pipeline_mode<synchronous>, transform_indices = @transform_1, window_bounds = array<i64: 128, 128>}, {pipeline_mode = #tpu.pipeline_mode<synchronous>, transform_indices = @transform_2, window_bounds = array<i64: 128, 128>}, {pipeline_mode = #tpu.pipeline_mode<synchronous>, transform_indices = @transform_3, window_bounds = array<i64: 1, 128>}, {pipeline_mode = #tpu.pipeline_mode<synchronous>, transform_indices = @transform_4, window_bounds = array<i64: 128, 128>}, {pipeline_mode = #tpu.pipeline_mode<synchronous>, transform_indices = @transform_5, window_bounds = array<i64: 1, 128>}, {transform_indices = @transform_6, window_bounds = array<i64: 8, 128>}, {transform_indices = @transform_7, window_bounds = array<i64: 128, 128>}, {pipeline_mode = #tpu.pipeline_mode<synchronous>, transform_indices = @transform_8, window_bounds = array<i64: 8, 128>}]} {
    %c0_i32 = arith.constant 0 : i32
    %0 = arith.cmpi eq, %arg0, %c0_i32 : i32
    %c0_i32_0 = arith.constant 0 : i32
    %1 = arith.cmpi eq, %arg1, %c0_i32_0 : i32
    %2 = arith.andi %0, %1 : i1
    %3 = arith.extui %2 : i1 to i32
    %c0_i32_1 = arith.constant 0 : i32
    %4 = arith.cmpi ne, %3, %c0_i32_1 : i32
    scf.if %4 {
      %c0_23 = arith.constant 0 : index
      %c0_24 = arith.constant 0 : index
      %40 = vector.load %arg3[%c0_23, %c0_24] : memref<128x128xbf16, #tpu.memory_space<vmem>>, vector<128x128xbf16>
      %c0_25 = arith.constant 0 : index
      %c0_26 = arith.constant 0 : index
      %41 = vector.load %arg4[%c0_25, %c0_26] : memref<128x128xbf16, #tpu.memory_space<vmem>>, vector<128x128xbf16>
      %cst_27 = arith.constant dense<0.000000e+00> : vector<128x128xf32>
      %42 = tpu.matmul %40, %41, %cst_27 {dimension_numbers = #tpu.dot_dimension_numbers<[1], [0], [0], [1], [0, 0, 1, 1], [], []>} : vector<128x128xbf16>, vector<128x128xbf16>, vector<128x128xf32> -> vector<128x128xf32>
      %43 = arith.truncf %42 : vector<128x128xf32> to vector<128x128xbf16>
      %c0_28 = arith.constant 0 : index
      %c0_29 = arith.constant 0 : index
      %44 = vector.load %arg11[%c0_28, %c0_29] : memref<128x128xbf16, #tpu.memory_space<vmem>>, vector<128x128xbf16>
      tpu.vector_store %arg11[%c0_28, %c0_29], %43 {strides = array<i32>} : memref<128x128xbf16, #tpu.memory_space<vmem>>, vector<128x128xbf16>,
    } else {
    }
    %c1_i32 = arith.constant 1 : i32
    %5 = arith.cmpi eq, %arg0, %c1_i32 : i32
    %c0_i32_2 = arith.constant 0 : i32
    %6 = arith.cmpi eq, %arg1, %c0_i32_2 : i32
    %7 = arith.andi %5, %6 : i1
    %8 = arith.extui %7 : i1 to i32
    %c0_i32_3 = arith.constant 0 : i32
    %9 = arith.cmpi ne, %8, %c0_i32_3 : i32
    scf.if %9 {
      %c0_23 = arith.constant 0 : index
      %c0_24 = arith.constant 0 : index
      %40 = vector.load %arg12[%c0_23, %c0_24] : memref<128x128xf32, #tpu.memory_space<vmem>>, vector<128x128xf32>
      %41 = arith.truncf %40 : vector<128x128xf32> to vector<128x128xbf16>
      %c0_25 = arith.constant 0 : index
      %c0_26 = arith.constant 0 : index
      %42 = vector.load %arg6[%c0_25, %c0_26] : memref<128x128xbf16, #tpu.memory_space<vmem>>, vector<128x128xbf16>
      %cst_27 = arith.constant dense<0.000000e+00> : vector<128x128xf32>
      %43 = tpu.matmul %41, %42, %cst_27 {dimension_numbers = #tpu.dot_dimension_numbers<[1], [0], [0], [1], [0, 0, 1, 1], [], []>} : vector<128x128xbf16>, vector<128x128xbf16>, vector<128x128xf32> -> vector<128x128xf32>
      %44 = arith.truncf %43 : vector<128x128xf32> to vector<128x128xbf16>
      %c0_28 = arith.constant 0 : index
      %c0_29 = arith.constant 0 : index
      %45 = vector.load %arg11[%c0_28, %c0_29] : memref<128x128xbf16, #tpu.memory_space<vmem>>, vector<128x128xbf16>
      tpu.vector_store %arg11[%c0_28, %c0_29], %44 {strides = array<i32>} : memref<128x128xbf16, #tpu.memory_space<vmem>>, vector<128x128xbf16>,
      %cst_30 = arith.constant 0.000000e+00 : f32
      %46 = vector.broadcast %cst_30 : f32 to vector<8x128xf32>
      %c0_31 = arith.constant 0 : index
      %c0_32 = arith.constant 0 : index
      %47 = vector.load %arg13[%c0_31, %c0_32] : memref<8x128xf32, #tpu.memory_space<vmem>>, vector<8x128xf32>
      tpu.vector_store %arg13[%c0_31, %c0_32], %46 {strides = array<i32>} : memref<8x128xf32, #tpu.memory_space<vmem>>, vector<8x128xf32>,
    } else {
    }
    %c0_i32_4 = arith.constant 0 : i32
    %10 = arith.cmpi eq, %arg0, %c0_i32_4 : i32
    %11 = arith.extui %10 : i1 to i32
    %12 = arith.sitofp %11 : i32 to f32
    %c0 = arith.constant 0 : index
    %c0_5 = arith.constant 0 : index
    %13 = vector.load %arg5[%c0, %c0_5] : memref<1x128xf32, #tpu.memory_space<vmem>>, vector<1x128xf32>
    %14 = vector.broadcast %12 : f32 to vector<1x128xf32>
    %15 = arith.mulf %14, %13 : vector<1x128xf32>
    %cst = arith.constant 1.000000e+00 : f32
    %16 = arith.subf %cst, %12 : f32
    %c0_6 = arith.constant 0 : index
    %c0_7 = arith.constant 0 : index
    %17 = vector.load %arg7[%c0_6, %c0_7] : memref<1x128xf32, #tpu.memory_space<vmem>>, vector<1x128xf32>
    %18 = vector.broadcast %16 : f32 to vector<1x128xf32>
    %19 = arith.mulf %18, %17 : vector<1x128xf32>
    %20 = arith.addf %15, %19 : vector<1x128xf32>
    %c0_8 = arith.constant 0 : index
    %c0_9 = arith.constant 0 : index
    %21 = vector.load %arg2[%c0_8, %c0_9] : memref<128x128xbf16, #tpu.memory_space<vmem>>, vector<128x128xbf16>
    %c0_10 = arith.constant 0 : index
    %c0_11 = arith.constant 0 : index
    %22 = vector.load %arg11[%c0_10, %c0_11] : memref<128x128xbf16, #tpu.memory_space<vmem>>, vector<128x128xbf16>
    %cst_12 = arith.constant dense<0.000000e+00> : vector<128x128xf32>
    %23 = tpu.matmul %21, %22, %cst_12 {dimension_numbers = #tpu.dot_dimension_numbers<[1], [0], [0], [1], [0, 0, 1, 1], [], []>} : vector<128x128xbf16>, vector<128x128xbf16>, vector<128x128xf32> -> vector<128x128xf32>
    %24 = vector.broadcast %20 : vector<1x128xf32> to vector<128x128xf32>
    %25 = arith.addf %23, %24 : vector<128x128xf32>
    %cst_13 = arith.constant 0.000000e+00 : f32
    %26 = vector.broadcast %cst_13 : f32 to vector<128x128xf32>
    %27 = arith.maximumf %25, %26 : vector<128x128xf32>
    %c0_i32_14 = arith.constant 0 : i32
    %28 = arith.cmpi eq, %arg0, %c0_i32_14 : i32
    %29 = arith.extui %28 : i1 to i32
    %c0_i32_15 = arith.constant 0 : i32
    %30 = arith.cmpi ne, %29, %c0_i32_15 : i32
    scf.if %30 {
      %c128_i32 = arith.constant 128 : i32
      %40 = arith.muli %arg1, %c128_i32 : i32
      %41 = tpu.assume_multiple %40, 128 : i32
      %42 = arith.index_cast %41 : i32 to index
      %c0_23 = arith.constant 0 : index
      %43 = vector.load %arg12[%42, %c0_23] : memref<128x128xf32, #tpu.memory_space<vmem>>, vector<128x128xf32>
      tpu.vector_store %arg12[%42, %c0_23], %27 {strides = array<i32>} : memref<128x128xf32, #tpu.memory_space<vmem>>, vector<128x128xf32>,
    } else {
    }
    %c0_16 = arith.constant 0 : index
    %c0_17 = arith.constant 0 : index
    %31 = vector.load %arg9[%c0_16, %c0_17] : memref<128x128xf32, #tpu.memory_space<vmem>>, vector<128x128xf32>
    tpu.vector_store %arg9[%c0_16, %c0_17], %27 {strides = array<i32>} : memref<128x128xf32, #tpu.memory_space<vmem>>, vector<128x128xf32>,
    %c1_i32_18 = arith.constant 1 : i32
    %32 = arith.cmpi eq, %arg0, %c1_i32_18 : i32
    %33 = arith.extui %32 : i1 to i32
    %c0_i32_19 = arith.constant 0 : i32
    %34 = arith.cmpi ne, %33, %c0_i32_19 : i32
    scf.if %34 {
      %c0_23 = arith.constant 0 : index
      %c0_24 = arith.constant 0 : index
      %40 = vector.load %arg13[%c0_23, %c0_24] : memref<8x128xf32, #tpu.memory_space<vmem>>, vector<8x128xf32>
      %c0_25 = arith.constant 0 : index
      %c0_26 = arith.constant 0 : index
      %41 = vector.load %arg8[%c0_25, %c0_26] : memref<8x128xf32, #tpu.memory_space<vmem>>, vector<8x128xf32>
      %cst_27 = arith.constant dense<0.000000e+00> : vector<8x128xf32>
      %42 = tpu.matmul %41, %27, %cst_27 {dimension_numbers = #tpu.dot_dimension_numbers<[1], [0], [0], [1], [0, 0, 1, 1], [], []>} : vector<8x128xf32>, vector<128x128xf32>, vector<8x128xf32> -> vector<8x128xf32>
      %43 = arith.addf %40, %42 : vector<8x128xf32>
      %c0_28 = arith.constant 0 : index
      %c0_29 = arith.constant 0 : index
      %44 = vector.load %arg13[%c0_28, %c0_29] : memref<8x128xf32, #tpu.memory_space<vmem>>, vector<8x128xf32>
      tpu.vector_store %arg13[%c0_28, %c0_29], %43 {strides = array<i32>} : memref<8x128xf32, #tpu.memory_space<vmem>>, vector<8x128xf32>,
    } else {
    }
    %c1_i32_20 = arith.constant 1 : i32
    %35 = arith.cmpi eq, %arg0, %c1_i32_20 : i32
    %c0_i32_21 = arith.constant 0 : i32
    %36 = arith.cmpi eq, %arg1, %c0_i32_21 : i32
    %37 = arith.andi %35, %36 : i1
    %38 = arith.extui %37 : i1 to i32
    %c0_i32_22 = arith.constant 0 : i32
    %39 = arith.cmpi ne, %38, %c0_i32_22 : i32
    scf.if %39 {
      %c0_23 = arith.constant 0 : index
      %c0_24 = arith.constant 0 : index
      %40 = vector.load %arg13[%c0_23, %c0_24] : memref<8x128xf32, #tpu.memory_space<vmem>>, vector<8x128xf32>
      %c0_25 = arith.constant 0 : index
      %c0_26 = arith.constant 0 : index
      %41 = vector.load %arg10[%c0_25, %c0_26] : memref<8x128xf32, #tpu.memory_space<vmem>>, vector<8x128xf32>
      tpu.vector_store %arg10[%c0_25, %c0_26], %40 {strides = array<i32>} : memref<8x128xf32, #tpu.memory_space<vmem>>, vector<8x128xf32>,
    } else {
    }
    return
  }
  func.func @transform_0(%arg0: i32, %arg1: i32) -> (i32, i32) {
    %c0_i32 = arith.constant 0 : i32
    %c0_i32_0 = arith.constant 0 : i32
    return %arg1, %c0_i32 : i32, i32
  }
  func.func @transform_1(%arg0: i32, %arg1: i32) -> (i32, i32) {
    %c0_i32 = arith.constant 0 : i32
    %c0_i32_0 = arith.constant 0 : i32
    %c0_i32_1 = arith.constant 0 : i32
    return %c0_i32, %c0_i32_0 : i32, i32
  }
  func.func @transform_2(%arg0: i32, %arg1: i32) -> (i32, i32) {
    %c0_i32 = arith.constant 0 : i32
    %c0_i32_0 = arith.constant 0 : i32
    %c0_i32_1 = arith.constant 0 : i32
    return %c0_i32, %c0_i32_0 : i32, i32
  }
  func.func @transform_3(%arg0: i32, %arg1: i32) -> (i32, i32) {
    %c0_i32 = arith.constant 0 : i32
    %c0_i32_0 = arith.constant 0 : i32
    %c0_i32_1 = arith.constant 0 : i32
    return %c0_i32, %c0_i32_0 : i32, i32
  }
  func.func @transform_4(%arg0: i32, %arg1: i32) -> (i32, i32) {
    %c0_i32 = arith.constant 0 : i32
    %c0_i32_0 = arith.constant 0 : i32
    %c0_i32_1 = arith.constant 0 : i32
    return %c0_i32, %c0_i32_0 : i32, i32
  }
  func.func @transform_5(%arg0: i32, %arg1: i32) -> (i32, i32) {
    %c0_i32 = arith.constant 0 : i32
    %c0_i32_0 = arith.constant 0 : i32
    %c0_i32_1 = arith.constant 0 : i32
    return %c0_i32, %c0_i32_0 : i32, i32
  }
  func.func @transform_6(%arg0: i32, %arg1: i32) -> (i32, i32) {
    %c0_i32 = arith.constant 0 : i32
    %c0_i32_0 = arith.constant 0 : i32
    return %c0_i32, %arg1 : i32, i32
  }
  func.func @transform_7(%arg0: i32, %arg1: i32) -> (i32, i32) {
    %c0_i32 = arith.constant 0 : i32
    %c0_i32_0 = arith.constant 0 : i32
    return %arg1, %c0_i32 : i32, i32
  }
  func.func @transform_8(%arg0: i32, %arg1: i32) -> (i32, i32) {
    %c0_i32 = arith.constant 0 : i32
    %c0_i32_0 = arith.constant 0 : i32
    %c0_i32_1 = arith.constant 0 : i32
    return %c0_i32, %c0_i32_0 : i32, i32
  }
}

module attributes {stable_mosaic.version = 11 : i64} {
  func.func @mlp_kernel(%arg0: i32, %arg1: memref<128x128xbf16, #tpu.memory_space<vmem>>, %arg2: memref<128x128xbf16, #tpu.memory_space<vmem>>, %arg3: memref<1x128xf32, #tpu.memory_space<vmem>>, %arg4: memref<128x128xbf16, #tpu.memory_space<vmem>>, %arg5: memref<1x128xf32, #tpu.memory_space<vmem>>, %arg6: memref<128x128xf32, #tpu.memory_space<vmem>>) attributes {dimension_semantics = [#tpu.dimension_semantics<parallel>], iteration_bounds = array<i64: 2>, scalar_prefetch = 0 : i64, scratch_operands = 0 : i64, tpu.core_type = #tpu.core_type<tc>, window_params = [{transform_indices = @transform_0, window_bounds = array<i64: 128, 128>}, {pipeline_mode = #tpu.pipeline_mode<synchronous>, transform_indices = @transform_1, window_bounds = array<i64: 128, 128>}, {pipeline_mode = #tpu.pipeline_mode<synchronous>, transform_indices = @transform_2, window_bounds = array<i64: 1, 128>}, {pipeline_mode = #tpu.pipeline_mode<synchronous>, transform_indices = @transform_3, window_bounds = array<i64: 128, 128>}, {pipeline_mode = #tpu.pipeline_mode<synchronous>, transform_indices = @transform_4, window_bounds = array<i64: 1, 128>}, {transform_indices = @transform_5, window_bounds = array<i64: 128, 128>}]} {
    %c0 = arith.constant 0 : index
    %c0_0 = arith.constant 0 : index
    %0 = vector.load %arg1[%c0, %c0_0] : memref<128x128xbf16, #tpu.memory_space<vmem>>, vector<128x128xbf16>
    %c0_1 = arith.constant 0 : index
    %c0_2 = arith.constant 0 : index
    %1 = vector.load %arg2[%c0_1, %c0_2] : memref<128x128xbf16, #tpu.memory_space<vmem>>, vector<128x128xbf16>
    %cst = arith.constant dense<0.000000e+00> : vector<128x128xf32>
    %2 = tpu.matmul %0, %1, %cst {dimension_numbers = #tpu.dot_dimension_numbers<[1], [0], [0], [1], [0, 0, 1, 1], [], []>} : vector<128x128xbf16>, vector<128x128xbf16>, vector<128x128xf32> -> vector<128x128xf32>
    %c0_3 = arith.constant 0 : index
    %c0_4 = arith.constant 0 : index
    %3 = vector.load %arg3[%c0_3, %c0_4] : memref<1x128xf32, #tpu.memory_space<vmem>>, vector<1x128xf32>
    %4 = vector.broadcast %3 : vector<1x128xf32> to vector<128x128xf32>
    %5 = arith.addf %2, %4 : vector<128x128xf32>
    %cst_5 = arith.constant 0.000000e+00 : f32
    %6 = vector.broadcast %cst_5 : f32 to vector<128x128xf32>
    %7 = arith.maximumf %5, %6 : vector<128x128xf32>
    %8 = arith.truncf %7 : vector<128x128xf32> to vector<128x128xbf16>
    %c0_6 = arith.constant 0 : index
    %c0_7 = arith.constant 0 : index
    %9 = vector.load %arg4[%c0_6, %c0_7] : memref<128x128xbf16, #tpu.memory_space<vmem>>, vector<128x128xbf16>
    %cst_8 = arith.constant dense<0.000000e+00> : vector<128x128xf32>
    %10 = tpu.matmul %8, %9, %cst_8 {dimension_numbers = #tpu.dot_dimension_numbers<[1], [0], [0], [1], [0, 0, 1, 1], [], []>} : vector<128x128xbf16>, vector<128x128xbf16>, vector<128x128xf32> -> vector<128x128xf32>
    %c0_9 = arith.constant 0 : index
    %c0_10 = arith.constant 0 : index
    %11 = vector.load %arg5[%c0_9, %c0_10] : memref<1x128xf32, #tpu.memory_space<vmem>>, vector<1x128xf32>
    %12 = vector.broadcast %11 : vector<1x128xf32> to vector<128x128xf32>
    %13 = arith.addf %10, %12 : vector<128x128xf32>
    %c0_11 = arith.constant 0 : index
    %c0_12 = arith.constant 0 : index
    %14 = vector.load %arg6[%c0_11, %c0_12] : memref<128x128xf32, #tpu.memory_space<vmem>>, vector<128x128xf32>
    tpu.vector_store %arg6[%c0_11, %c0_12], %13 {strides = array<i32>} : memref<128x128xf32, #tpu.memory_space<vmem>>, vector<128x128xf32>,
    return
  }
  func.func @transform_0(%arg0: i32) -> (i32, i32) {
    %c0_i32 = arith.constant 0 : i32
    %c0_i32_0 = arith.constant 0 : i32
    return %arg0, %c0_i32 : i32, i32
  }
  func.func @transform_1(%arg0: i32) -> (i32, i32) {
    %c0_i32 = arith.constant 0 : i32
    %c0_i32_0 = arith.constant 0 : i32
    %c0_i32_1 = arith.constant 0 : i32
    return %c0_i32, %c0_i32_0 : i32, i32
  }
  func.func @transform_2(%arg0: i32) -> (i32, i32) {
    %c0_i32 = arith.constant 0 : i32
    %c0_i32_0 = arith.constant 0 : i32
    %c0_i32_1 = arith.constant 0 : i32
    return %c0_i32, %c0_i32_0 : i32, i32
  }
  func.func @transform_3(%arg0: i32) -> (i32, i32) {
    %c0_i32 = arith.constant 0 : i32
    %c0_i32_0 = arith.constant 0 : i32
    %c0_i32_1 = arith.constant 0 : i32
    return %c0_i32, %c0_i32_0 : i32, i32
  }
  func.func @transform_4(%arg0: i32) -> (i32, i32) {
    %c0_i32 = arith.constant 0 : i32
    %c0_i32_0 = arith.constant 0 : i32
    %c0_i32_1 = arith.constant 0 : i32
    return %c0_i32, %c0_i32_0 : i32, i32
  }
  func.func @transform_5(%arg0: i32) -> (i32, i32) {
    %c0_i32 = arith.constant 0 : i32
    %c0_i32_0 = arith.constant 0 : i32
    return %arg0, %c0_i32 : i32, i32
  }
}

module attributes {stable_mosaic.version = 11 : i64} {
  func.func @mlp_kernel(%arg0: i32, %arg1: memref<16x128xbf16, #tpu.memory_space<vmem>>, %arg2: memref<128x128xbf16, #tpu.memory_space<vmem>>, %arg3: memref<1x128xf32, #tpu.memory_space<vmem>>, %arg4: memref<128x128xbf16, #tpu.memory_space<vmem>>, %arg5: memref<1x128xf32, #tpu.memory_space<vmem>>, %arg6: memref<16x128xf32, #tpu.memory_space<vmem>>) attributes {dimension_semantics = [#tpu.dimension_semantics<parallel>], iteration_bounds = array<i64: 1>, scalar_prefetch = 0 : i64, scratch_operands = 0 : i64, tpu.core_type = #tpu.core_type<tc>, window_params = [{transform_indices = @transform_0, window_bounds = array<i64: 16, 128>}, {pipeline_mode = #tpu.pipeline_mode<synchronous>, transform_indices = @transform_1, window_bounds = array<i64: 128, 128>}, {pipeline_mode = #tpu.pipeline_mode<synchronous>, transform_indices = @transform_2, window_bounds = array<i64: 1, 128>}, {pipeline_mode = #tpu.pipeline_mode<synchronous>, transform_indices = @transform_3, window_bounds = array<i64: 128, 128>}, {pipeline_mode = #tpu.pipeline_mode<synchronous>, transform_indices = @transform_4, window_bounds = array<i64: 1, 128>}, {transform_indices = @transform_5, window_bounds = array<i64: 16, 128>}]} {
    %c0 = arith.constant 0 : index
    %c0_0 = arith.constant 0 : index
    %0 = vector.load %arg1[%c0, %c0_0] : memref<16x128xbf16, #tpu.memory_space<vmem>>, vector<16x128xbf16>
    %c0_1 = arith.constant 0 : index
    %c0_2 = arith.constant 0 : index
    %1 = vector.load %arg2[%c0_1, %c0_2] : memref<128x128xbf16, #tpu.memory_space<vmem>>, vector<128x128xbf16>
    %cst = arith.constant dense<0.000000e+00> : vector<16x128xf32>
    %2 = tpu.matmul %0, %1, %cst {dimension_numbers = #tpu.dot_dimension_numbers<[1], [0], [0], [1], [0, 0, 1, 1], [], []>} : vector<16x128xbf16>, vector<128x128xbf16>, vector<16x128xf32> -> vector<16x128xf32>
    %c0_3 = arith.constant 0 : index
    %c0_4 = arith.constant 0 : index
    %3 = vector.load %arg3[%c0_3, %c0_4] : memref<1x128xf32, #tpu.memory_space<vmem>>, vector<1x128xf32>
    %4 = vector.broadcast %3 : vector<1x128xf32> to vector<16x128xf32>
    %5 = arith.addf %2, %4 : vector<16x128xf32>
    %cst_5 = arith.constant 0.000000e+00 : f32
    %6 = vector.broadcast %cst_5 : f32 to vector<16x128xf32>
    %7 = arith.maximumf %5, %6 : vector<16x128xf32>
    %8 = arith.truncf %7 : vector<16x128xf32> to vector<16x128xbf16>
    %c0_6 = arith.constant 0 : index
    %c0_7 = arith.constant 0 : index
    %9 = vector.load %arg4[%c0_6, %c0_7] : memref<128x128xbf16, #tpu.memory_space<vmem>>, vector<128x128xbf16>
    %cst_8 = arith.constant dense<0.000000e+00> : vector<16x128xf32>
    %10 = tpu.matmul %8, %9, %cst_8 {dimension_numbers = #tpu.dot_dimension_numbers<[1], [0], [0], [1], [0, 0, 1, 1], [], []>} : vector<16x128xbf16>, vector<128x128xbf16>, vector<16x128xf32> -> vector<16x128xf32>
    %c0_9 = arith.constant 0 : index
    %c0_10 = arith.constant 0 : index
    %11 = vector.load %arg5[%c0_9, %c0_10] : memref<1x128xf32, #tpu.memory_space<vmem>>, vector<1x128xf32>
    %12 = vector.broadcast %11 : vector<1x128xf32> to vector<16x128xf32>
    %13 = arith.addf %10, %12 : vector<16x128xf32>
    %c0_11 = arith.constant 0 : index
    %c0_12 = arith.constant 0 : index
    %14 = vector.load %arg6[%c0_11, %c0_12] : memref<16x128xf32, #tpu.memory_space<vmem>>, vector<16x128xf32>
    tpu.vector_store %arg6[%c0_11, %c0_12], %13 {strides = array<i32>} : memref<16x128xf32, #tpu.memory_space<vmem>>, vector<16x128xf32>,
    return
  }
  func.func @transform_0(%arg0: i32) -> (i32, i32) {
    %c0_i32 = arith.constant 0 : i32
    %c0_i32_0 = arith.constant 0 : i32
    return %arg0, %c0_i32 : i32, i32
  }
  func.func @transform_1(%arg0: i32) -> (i32, i32) {
    %c0_i32 = arith.constant 0 : i32
    %c0_i32_0 = arith.constant 0 : i32
    %c0_i32_1 = arith.constant 0 : i32
    return %c0_i32, %c0_i32_0 : i32, i32
  }
  func.func @transform_2(%arg0: i32) -> (i32, i32) {
    %c0_i32 = arith.constant 0 : i32
    %c0_i32_0 = arith.constant 0 : i32
    %c0_i32_1 = arith.constant 0 : i32
    return %c0_i32, %c0_i32_0 : i32, i32
  }
  func.func @transform_3(%arg0: i32) -> (i32, i32) {
    %c0_i32 = arith.constant 0 : i32
    %c0_i32_0 = arith.constant 0 : i32
    %c0_i32_1 = arith.constant 0 : i32
    return %c0_i32, %c0_i32_0 : i32, i32
  }
  func.func @transform_4(%arg0: i32) -> (i32, i32) {
    %c0_i32 = arith.constant 0 : i32
    %c0_i32_0 = arith.constant 0 : i32
    %c0_i32_1 = arith.constant 0 : i32
    return %c0_i32, %c0_i32_0 : i32, i32
  }
  func.func @transform_5(%arg0: i32) -> (i32, i32) {
    %c0_i32 = arith.constant 0 : i32
    %c0_i32_0 = arith.constant 0 : i32
    return %arg0, %c0_i32 : i32, i32
  }
}

</mosaic_0001>

<bundles_post_ra>
// kernel: encoder_forward.7
= control target key start
LH: loop header
LB: loop body
LE: loop exit
PB: predicated region body
PF: predicated region fallthrough
CT: control target
= control target key end

     0   :  { %v358_v0 = vmov 0.0   ;;  %vm359_vm0 = vmmov 0   ;;  %s453_s1 = inlined_call_operand.vmem [shape: bf16[128,128], index: 1, kind: input, shape index: {}]   ;;  %s454_s3 = inlined_call_operand.vmem [shape: bf16[128,128], index: 3, kind: input, shape index: {}]   ;;  %s455_s0 = inlined_call_operand.vmem [shape: bf16[16,128], index: 0, kind: input, shape index: {}]   ;;  %s456_s2 = inlined_call_operand.vmem [shape: f32[1,128], index: 2, kind: input, shape index: {}]   ;;  %s457_s4 = inlined_call_operand.vmem [shape: f32[1,128], index: 4, kind: input, shape index: {}]   ;;  %s458_s5 = inlined_call_operand.vmem [shape: f32[16,128], index: 5, kind: output, shape index: {}]  }
   0x1   :  { %299 = vmatprep.subr.bf16.mxu0 %v358_v0  ;;  %v341_v1 = vld [vmem:[%s453_s1 + $0x38] sm:$0xff]   ;;  %315 = vmatprep.mubr.msk.bf16.mxu0 %vm359_vm0, %v358_v0  ;;  %v342_v2 = vld [vmem:[%s453_s1 + $0x30] sm:$0xff]   ;;  %v343_v3 = vld [vmem:[%s453_s1 + $0x28] sm:$0xff]  }
   0x2   :  { %319 = vmatprep.subr.bf16.mxu1 %v358_v0  ;;  %335 = vmatprep.mubr.msk.bf16.mxu1 %vm359_vm0, %v358_v0  ;;  %v350_v4 = vld [vmem:[%s454_s3 + $0x38] sm:$0xff]   ;;  %v344_v5 = vld [vmem:[%s453_s1 + $0x20] sm:$0xff]   ;;  %v351_v6 = vld [vmem:[%s454_s3 + $0x30] sm:$0xff]  }
   0x3   :  { %300 = vmatpush3.bf16.msra.mxu0 %v341_v1  ;;  %320 = vmatpush3.bf16.msra.mxu1 %v350_v4  ;;  %v345_v7 = vld [vmem:[%s453_s1 + $0x18] sm:$0xff]   ;;  %v352_v8 = vld [vmem:[%s454_s3 + $0x28] sm:$0xff]   ;;  %v346_v9 = vld [vmem:[%s453_s1 + $0x10] sm:$0xff]  }
   0x4   :  { %301 = vmatprep.subr.bf16.mxu0 %v358_v0  ;;  %321 = vmatprep.subr.bf16.mxu1 %v358_v0  ;;  %v353_v10 = vld [vmem:[%s454_s3 + $0x20] sm:$0xff]   ;;  %v347_v11 = vld [vmem:[%s453_s1 + $0x8] sm:$0xff]   ;;  %v354_v12 = vld [vmem:[%s454_s3 + $0x18] sm:$0xff]  }
   0x5   :  { %v348_v13 = vld [vmem:[%s453_s1] sm:$0xff]   ;;  %v355_v15 = vld [vmem:[%s454_s3 + $0x10] sm:$0xff]   ;;  %v356_v16 = vld [vmem:[%s454_s3 + $0x8] sm:$0xff]  }
   0x6   :  { %v349_v14 = vld [vmem:[%s455_s0] sm:$0xff]  }
   0x7   :  { %302 = vmatpush3.bf16.msra.mxu0 %v342_v2  ;;  %322 = vmatpush3.bf16.msra.mxu1 %v351_v6  ;;  %v357_v17 = vld [vmem:[%s454_s3] sm:$0xff]  }
   0x8   :  { %303 = vmatprep.subr.bf16.mxu0 %v358_v0  ;;  %323 = vmatprep.subr.bf16.mxu1 %v358_v0  ;;  %v262_v18 = vld [vmem:[%s456_s2] ss:$0 sm:$0xff] }
   0x9   :  { %v272_v28 = vld [vmem:[%s457_s4] ss:$0 sm:$0xff] }
   0xb   :  { %304 = vmatpush3.bf16.msra.mxu0 %v343_v3  ;;  %324 = vmatpush3.bf16.msra.mxu1 %v352_v8 }
   0xc   :  { %305 = vmatprep.subr.bf16.mxu0 %v358_v0  ;;  %325 = vmatprep.subr.bf16.mxu1 %v358_v0 }
   0xf   :  { %306 = vmatpush3.bf16.msra.mxu0 %v344_v5  ;;  %326 = vmatpush3.bf16.msra.mxu1 %v353_v10 }
  0x10   :  { %307 = vmatprep.subr.bf16.mxu0 %v358_v0  ;;  %327 = vmatprep.subr.bf16.mxu1 %v358_v0 }
  0x13   :  { %308 = vmatpush3.bf16.msra.mxu0 %v345_v7  ;;  %328 = vmatpush3.bf16.msra.mxu1 %v354_v12 }
  0x14   :  { %309 = vmatprep.subr.bf16.mxu0 %v358_v0  ;;  %329 = vmatprep.subr.bf16.mxu1 %v358_v0 }
  0x17   :  { %310 = vmatpush3.bf16.msra.mxu0 %v346_v9  ;;  %330 = vmatpush3.bf16.msra.mxu1 %v355_v15 }
  0x18   :  { %311 = vmatprep.subr.bf16.mxu0 %v358_v0  ;;  %331 = vmatprep.subr.bf16.mxu1 %v358_v0 }
  0x1b   :  { %312 = vmatpush3.bf16.msra.mxu0 %v347_v11  ;;  %332 = vmatpush3.bf16.msra.mxu1 %v356_v16 }
  0x1c   :  { %313 = vmatprep.subr.bf16.mxu0 %v358_v0  ;;  %333 = vmatprep.subr.bf16.mxu1 %v358_v0 }
  0x1f   :  { %314 = vmatpush3.bf16.msra.mxu0 %v348_v13  ;;  %334 = vmatpush3.bf16.msra.mxu1 %v357_v17 }
  0x22   :  { %316 = vmatmul.mubr.bf16.vlgmr.msra.gmra.mxu0 %v349_v14 }
  0xe2   :  { %v134_v19 = vpop.f32.mrf.mxu0 }
  0xe3   :  { %v135_v21 = vadd.f32 %v262_v18, %v134_v19 }
  0xe4   :  { %v317_v20 = vpop.f32.mrf.mxu0 }
  0xe5   :  { %v141_v25 = vmax.f32 %v135_v21, 0.0 }
  0xe6   :  { %v137_v22 = vpop.f32.mrf.mxu0 }
  0xe7   :  { %v138_v23 = vadd.f32 %v262_v18, %v137_v22 }
  0xe8   :  { %v318_v24 = vpop.f32.mrf.mxu0 }
  0xe9   :  { %v142_v26 = vmax.f32 %v138_v23, 0.0 }
  0xeb   :  { %v143_v27 = vpack.c.bf16 %v142_v26, %v141_v25 }
  0xed   :  { %336 = vmatmul.mubr.bf16.vlgmr.msra.gmra.mxu1 %v143_v27 }
 0x1ad   :  { %v249_v29 = vpop.f32.mrf.mxu1 }
 0x1ae   :  { %v250_v30 = vadd.f32 %v272_v28, %v249_v29 }
 0x1af   :  { %v337_v31 = vpop.f32.mrf.mxu1 }
 0x1b0   :  { %256 = vst [vmem:[%s458_s5] sm:$0xff] %v250_v30 }
 0x1b1   :  { %v252_v32 = vpop.f32.mrf.mxu1 }
 0x1b2   :  { %v253_v33 = vadd.f32 %v272_v28, %v252_v32 }
 0x1b3   :  { %v338_v34 = vpop.f32.mrf.mxu1 }
 0x1b4   :  { %257 = vst [vmem:[%s458_s5 + $0x8] sm:$0xff] %v253_v33 }

// kernel: encoder_forward.6
= control target key start
LH: loop header
LB: loop body
LE: loop exit
PB: predicated region body
PF: predicated region fallthrough
CT: control target
= control target key end

     0   :  { %s928_s18 = smov 0   ;;  %s1031_s0 = inlined_call_operand.vmem [shape: bf16[256,128], index: 0, kind: input, shape index: {}]   ;;  %s1032_s1 = inlined_call_operand.vmem [shape: bf16[128,128], index: 1, kind: input, shape index: {}]   ;;  %s1033_s2 = inlined_call_operand.vmem [shape: f32[1,128], index: 2, kind: input, shape index: {}]   ;;  %s1034_s3 = inlined_call_operand.vmem [shape: bf16[128,128], index: 3, kind: input, shape index: {}]   ;;  %s1035_s4 = inlined_call_operand.vmem [shape: f32[1,128], index: 4, kind: input, shape index: {}]   ;;  %s1036_s5 = inlined_call_operand.vmem [shape: f32[256,128], index: 5, kind: output, shape index: {}]  }
   0x1 LB: > { %s725_s19 = sadd.s32 4294967295, %s896_s18   ;;  %p729_p0 = scmp.ge.s32.totalorder %s896_s18, 1  ;;  %s896_s18 = sphi %s928_s18, %s15_s18  }
   0x2   : > { %p188_p1 = scmp.lt.s32.totalorder %s896_s18, 3 }
   0x4   : > { %p189_p2 = pnand %p729_p0, %p188_p1 }
   0x5   : > { %s730_s22 = sshll.u32 (!%p189_p2), %s725_s19, 4 }
   0x6   : > { %192 = sbr.rel (%p189_p2) target bundleno = 476 (0x1dc), region = 40  ;;  %p217_p3 = scmp.lt.s32.totalorder (!%p189_p2), %s730_s22, 31 }
   0xb   : > { %v866_v0 = vld [vmem:[%s1032_s1 + $0x38] sm:$0xff]   ;;  %v867_v1 = vld [vmem:[%s1032_s1 + $0x30] sm:$0xff]   ;;  %s1038_s22 = smov (!%p217_p3, %s730_s22), 31  ;;  %v868_v2 = vld [vmem:[%s1032_s1 + $0x28] sm:$0xff]  }
   0xc   : > { %794 = vmatprep.subr.bf16.mxu0 %v866_v0  ;;  %s731_s27 = sshll.u32 %s1038_s22, 2  ;;  %v869_v3 = vld [vmem:[%s1032_s1 + $0x20] sm:$0xff]   ;;  %v870_v5 = vld [vmem:[%s1032_s1 + $0x18] sm:$0xff]   ;;  %v871_v6 = vld [vmem:[%s1032_s1 + $0x10] sm:$0xff]   ;;  %s733_s11 = sshll.u32 %s1038_s22, 3 }
   0xd   : > { %795 = vmatpush3.bf16.msra.mxu0 %v866_v0  ;;  %s951_s30 = scalar_lea.vmem %s1031_s0, %s731_s27  ;;  %v882_v7 = vld [vmem:[%s1034_s3 + $0x38] sm:$0xff]   ;;  %v883_v8 = vld [vmem:[%s1034_s3 + $0x30] sm:$0xff]   ;;  %v872_v9 = vld [vmem:[%s1032_s1 + $0x8] sm:$0xff]   ;;  %s1010_s16 = scalar_lea.vmem %s1036_s5, %s733_s11 }
   0xe   : > { %796 = vmatprep.subr.bf16.mxu0 %v867_v1  ;;  %v874_v4 = vld [vmem:[%s951_s30] sm:$0xff]   ;;  %826 = vmatprep.subr.bf16.mxu1 %v882_v7  ;;  %v884_v10 = vld [vmem:[%s1034_s3 + $0x28] sm:$0xff]   ;;  %v886_v13 = vld [vmem:[%s1034_s3 + $0x18] sm:$0xff]  }
   0xf   : > { %810 = vmatprep.mubr.bf16.mxu0 %v874_v4  ;;  %827 = vmatpush3.bf16.msra.mxu1 %v882_v7  ;;  %v873_v11 = vld [vmem:[%s1032_s1] sm:$0xff]   ;;  %v875_v14 = vld [vmem:[%s951_s30 + $0x8] sm:$0xff]   ;;  %v876_v15 = vld [vmem:[%s951_s30 + $0x10] sm:$0xff]  }
  0x10   : > { %828 = vmatprep.subr.bf16.mxu1 %v883_v8  ;;  %v885_v12 = vld [vmem:[%s1034_s3 + $0x20] sm:$0xff]   ;;  %v877_v16 = vld [vmem:[%s951_s30 + $0x18] sm:$0xff]   ;;  %v879_v18 = vld [vmem:[%s951_s30 + $0x28] sm:$0xff]  }
  0x11   : > { %797 = vmatpush3.bf16.msra.mxu0 %v867_v1  ;;  %v878_v17 = vld [vmem:[%s951_s30 + $0x20] sm:$0xff]   ;;  %v880_v19 = vld [vmem:[%s951_s30 + $0x30] sm:$0xff]   ;;  %v881_v20 = vld [vmem:[%s951_s30 + $0x38] sm:$0xff]  }
  0x12   : > { %798 = vmatprep.subr.bf16.mxu0 %v868_v2  ;;  %v887_v21 = vld [vmem:[%s1034_s3 + $0x10] sm:$0xff]   ;;  %v888_v22 = vld [vmem:[%s1034_s3 + $0x8] sm:$0xff]   ;;  %v889_v23 = vld [vmem:[%s1034_s3] sm:$0xff]  }
  0x13   : > { %829 = vmatpush3.bf16.msra.mxu1 %v883_v8  ;;  %v734_v26 = vld [vmem:[%s1033_s2] ss:$0 sm:$0xff] }
  0x14   : > { %830 = vmatprep.subr.bf16.mxu1 %v884_v10 }
  0x15   : > { %799 = vmatpush3.bf16.msra.mxu0 %v868_v2 }
  0x16   : > { %800 = vmatprep.subr.bf16.mxu0 %v869_v3 }
  0x17   : > { %831 = vmatpush3.bf16.msra.mxu1 %v884_v10 }
  0x18   : > { %832 = vmatprep.subr.bf16.mxu1 %v885_v12 }
  0x19   : > { %801 = vmatpush3.bf16.msra.mxu0 %v869_v3 }
  0x1a   : > { %802 = vmatprep.subr.bf16.mxu0 %v870_v5 }
  0x1b   : > { %833 = vmatpush3.bf16.msra.mxu1 %v885_v12 }
  0x1c   : > { %834 = vmatprep.subr.bf16.mxu1 %v886_v13 }
  0x1d   : > { %803 = vmatpush3.bf16.msra.mxu0 %v870_v5 }
  0x1e   : > { %804 = vmatprep.subr.bf16.mxu0 %v871_v6 }
  0x1f   : > { %835 = vmatpush3.bf16.msra.mxu1 %v886_v13 }
  0x20   : > { %836 = vmatprep.subr.bf16.mxu1 %v887_v21 }
  0x21   : > { %805 = vmatpush3.bf16.msra.mxu0 %v871_v6 }
  0x22   : > { %806 = vmatprep.subr.bf16.mxu0 %v872_v9 }
  0x23   : > { %837 = vmatpush3.bf16.msra.mxu1 %v887_v21 }
  0x24   : > { %838 = vmatprep.subr.bf16.mxu1 %v888_v22 }
  0x25   : > { %807 = vmatpush3.bf16.msra.mxu0 %v872_v9 }
  0x26   : > { %808 = vmatprep.subr.bf16.mxu0 %v873_v11 }
  0x27   : > { %839 = vmatpush3.bf16.msra.mxu1 %v888_v22 }
  0x28   : > { %840 = vmatprep.subr.bf16.mxu1 %v889_v23 }
  0x29   : > { %809 = vmatpush3.bf16.msra.mxu0 %v873_v11 }
  0x2b   : > { %841 = vmatpush3.bf16.msra.mxu1 %v889_v23 }
  0x2c   : > { %811 = vmatmul.mubr.bf16.vlgmr.msra.gmra.mxu0 %v875_v14 }
  0x2d   : > { %814 = vmatprep.mubr.bf16.mxu0 %v876_v15 }
  0x34   : > { %815 = vmatmul.mubr.bf16.gmra.mxu0 %v877_v16 }
  0x35   : > { %818 = vmatprep.mubr.bf16.mxu0 %v878_v17  ;;  %v751_v17 = vld [vmem:[%s1035_s4] ss:$0 sm:$0xff] }
  0x3c   : > { %819 = vmatmul.mubr.bf16.gmra.mxu0 %v879_v18 }
  0x3d   : > { %822 = vmatprep.mubr.bf16.mxu0 %v880_v19 }
  0x44   : > { %823 = vmatmul.mubr.bf16.gmra.mxu0 %v881_v20 }
  0xec   : > { %v812_v24 = vpop.f32.mrf.mxu0 }
  0xed   : > { %v407_v30 = vadd.f32 %v812_v24, %v734_v26 }
  0xee   : > { %v398_v25 = vpop.f32.mrf.mxu0 }
  0xef   : > { %v399_v28 = vadd.f32 %v734_v26, %v398_v25  ;;  %v463_v37 = vmax.f32 %v407_v30, 0.0 }
  0xf0   : > { %v813_v27 = vpop.f32.mrf.mxu0 }
  0xf1   : > { %v410_v29 = vadd.f32 %v813_v27, %v734_v26  ;;  %v461_v35 = vmax.f32 %v399_v28, 0.0 }
  0xf2   : > { %v401_v31 = vpop.f32.mrf.mxu0 }
  0xf3   : > { %v402_v32 = vadd.f32 %v734_v26, %v401_v31  ;;  %v464_v33 = vmax.f32 %v410_v29, 0.0 }
  0xf4   : > { %v816_v34 = vpop.f32.mrf.mxu0 }
  0xf5   : > { %v462_v36 = vmax.f32 %v402_v32, 0.0  ;;  %v478_v40 = vpack.c.bf16 %v464_v33, %v463_v37  ;;  %v423_v44 = vadd.f32 %v816_v34, %v734_v26 }
  0xf6   : > { %v414_v38 = vpop.f32.mrf.mxu0 }
  0xf7   : > { %v477_v39 = vpack.c.bf16 %v462_v36, %v461_v35  ;;  %v415_v42 = vadd.f32 %v734_v26, %v414_v38  ;;  %v467_v51 = vmax.f32 %v423_v44, 0.0 }
  0xf8   : > { %v817_v41 = vpop.f32.mrf.mxu0 }
  0xf9   : > { %v426_v43 = vadd.f32 %v817_v41, %v734_v26  ;;  %842 = vmatprep.mubr.bf16.mxu1 %v477_v39  ;;  %v465_v49 = vmax.f32 %v415_v42, 0.0 }
  0xfa   : > { %v417_v45 = vpop.f32.mrf.mxu0  ;;  %843 = vmatmul.mubr.bf16.vlgmr.msra.gmra.mxu1 %v478_v40 }
  0xfb   : > { %v418_v46 = vadd.f32 %v734_v26, %v417_v45  ;;  %v468_v47 = vmax.f32 %v426_v43, 0.0 }
  0xfc   : > { %v820_v48 = vpop.f32.mrf.mxu0 }
  0xfd   : > { %v466_v50 = vmax.f32 %v418_v46, 0.0  ;;  %v480_v54 = vpack.c.bf16 %v468_v47, %v467_v51  ;;  %v439_v58 = vadd.f32 %v820_v48, %v734_v26 }
  0xfe   : > { %v430_v52 = vpop.f32.mrf.mxu0 }
  0xff   : > { %v479_v53 = vpack.c.bf16 %v466_v50, %v465_v49  ;;  %v431_v56 = vadd.f32 %v734_v26, %v430_v52  ;;  %v471_v1 = vmax.f32 %v439_v58, 0.0 }
 0x100   : > { %v821_v55 = vpop.f32.mrf.mxu0 }
 0x101   : > { %v442_v57 = vadd.f32 %v821_v55, %v734_v26  ;;  %846 = vmatprep.mubr.bf16.mxu1 %v479_v53  ;;  %v469_v63 = vmax.f32 %v431_v56, 0.0 }
 0x102   : > { %v433_v59 = vpop.f32.mrf.mxu0  ;;  %847 = vmatmul.mubr.bf16.gmra.mxu1 %v480_v54 }
 0x103   : > { %v434_v60 = vadd.f32 %v734_v26, %v433_v59  ;;  %v472_v61 = vmax.f32 %v442_v57, 0.0 }
 0x104   : > { %v824_v62 = vpop.f32.mrf.mxu0 }
 0x105   : > { %v470_v0 = vmax.f32 %v434_v60, 0.0  ;;  %v482_v4 = vpack.c.bf16 %v472_v61, %v471_v1  ;;  %v455_v8 = vadd.f32 %v824_v62, %v734_v26 }
 0x106   : > { %v446_v2 = vpop.f32.mrf.mxu0 }
 0x107   : > { %v481_v3 = vpack.c.bf16 %v470_v0, %v469_v63  ;;  %v447_v6 = vadd.f32 %v734_v26, %v446_v2  ;;  %v475_v14 = vmax.f32 %v455_v8, 0.0 }
 0x108   : > { %v825_v5 = vpop.f32.mrf.mxu0 }
 0x109   : > { %v458_v7 = vadd.f32 %v825_v5, %v734_v26  ;;  %850 = vmatprep.mubr.bf16.mxu1 %v481_v3  ;;  %v473_v12 = vmax.f32 %v447_v6, 0.0 }
 0x10a   : > { %v449_v9 = vpop.f32.mrf.mxu0  ;;  %851 = vmatmul.mubr.bf16.gmra.mxu1 %v482_v4 }
 0x10b   : > { %v450_v10 = vadd.f32 %v734_v26, %v449_v9  ;;  %v476_v11 = vmax.f32 %v458_v7, 0.0 }
 0x10d   : > { %v474_v13 = vmax.f32 %v450_v10, 0.0  ;;  %v484_v16 = vpack.c.bf16 %v476_v11, %v475_v14 }
 0x10f   : > { %v483_v15 = vpack.c.bf16 %v474_v13, %v473_v12 }
 0x111   : > { %854 = vmatprep.mubr.bf16.mxu1 %v483_v15 }
 0x112   : > { %855 = vmatmul.mubr.bf16.gmra.mxu1 %v484_v16 }
 0x1ba   : > { %v844_v18 = vpop.f32.mrf.mxu1 }
 0x1bb   : > { %v599_v19 = vadd.f32 %v844_v18, %v751_v17 }
 0x1bc   : > { %v590_v20 = vpop.f32.mrf.mxu1 }
 0x1bd   : > { %655 = vst [vmem:[%s1010_s16 + $0x10] sm:$0xff] %v599_v19  ;;  %v591_v21 = vadd.f32 %v751_v17, %v590_v20 }
 0x1be   : > { %v845_v22 = vpop.f32.mrf.mxu1 }
 0x1bf   : > { %653 = vst [vmem:[%s1010_s16] sm:$0xff] %v591_v21  ;;  %v602_v23 = vadd.f32 %v845_v22, %v751_v17 }
 0x1c0   : > { %v593_v24 = vpop.f32.mrf.mxu1 }
 0x1c1   : > { %656 = vst [vmem:[%s1010_s16 + $0x18] sm:$0xff] %v602_v23  ;;  %v594_v25 = vadd.f32 %v751_v17, %v593_v24 }
 0x1c2   : > { %v848_v26 = vpop.f32.mrf.mxu1 }
 0x1c3   : > { %654 = vst [vmem:[%s1010_s16 + $0x8] sm:$0xff] %v594_v25  ;;  %v615_v27 = vadd.f32 %v848_v26, %v751_v17 }
 0x1c4   : > { %v606_v28 = vpop.f32.mrf.mxu1 }
 0x1c5   : > { %659 = vst [vmem:[%s1010_s16 + $0x30] sm:$0xff] %v615_v27  ;;  %v607_v29 = vadd.f32 %v751_v17, %v606_v28 }
 0x1c6   : > { %v849_v30 = vpop.f32.mrf.mxu1 }
 0x1c7   : > { %657 = vst [vmem:[%s1010_s16 + $0x20] sm:$0xff] %v607_v29  ;;  %v618_v31 = vadd.f32 %v849_v30, %v751_v17 }
 0x1c8   : > { %v609_v32 = vpop.f32.mrf.mxu1 }
 0x1c9   : > { %660 = vst [vmem:[%s1010_s16 + $0x38] sm:$0xff] %v618_v31  ;;  %v610_v33 = vadd.f32 %v751_v17, %v609_v32 }
 0x1ca   : > { %v852_v34 = vpop.f32.mrf.mxu1 }
 0x1cb   : > { %658 = vst [vmem:[%s1010_s16 + $0x28] sm:$0xff] %v610_v33  ;;  %v631_v35 = vadd.f32 %v852_v34, %v751_v17 }
 0x1cc   : > { %v622_v36 = vpop.f32.mrf.mxu1 }
 0x1cd   : > { %663 = vst [vmem:[%s1010_s16 + $0x50] sm:$0xff] %v631_v35  ;;  %v623_v37 = vadd.f32 %v751_v17, %v622_v36 }
 0x1ce   : > { %v853_v38 = vpop.f32.mrf.mxu1 }
 0x1cf   : > { %661 = vst [vmem:[%s1010_s16 + $0x40] sm:$0xff] %v623_v37  ;;  %v634_v39 = vadd.f32 %v853_v38, %v751_v17 }
 0x1d0   : > { %v625_v40 = vpop.f32.mrf.mxu1 }
 0x1d1   : > { %664 = vst [vmem:[%s1010_s16 + $0x58] sm:$0xff] %v634_v39  ;;  %v626_v41 = vadd.f32 %v751_v17, %v625_v40 }
 0x1d2   : > { %v856_v42 = vpop.f32.mrf.mxu1 }
 0x1d3   : > { %662 = vst [vmem:[%s1010_s16 + $0x48] sm:$0xff] %v626_v41  ;;  %v647_v43 = vadd.f32 %v856_v42, %v751_v17 }
 0x1d4   : > { %v638_v44 = vpop.f32.mrf.mxu1 }
 0x1d5   : > { %667 = vst [vmem:[%s1010_s16 + $0x70] sm:$0xff] %v647_v43  ;;  %v639_v45 = vadd.f32 %v751_v17, %v638_v44 }
 0x1d6   : > { %v857_v46 = vpop.f32.mrf.mxu1 }
 0x1d7   : > { %665 = vst [vmem:[%s1010_s16 + $0x60] sm:$0xff] %v639_v45  ;;  %v650_v47 = vadd.f32 %v857_v46, %v751_v17 }
 0x1d8   : > { %v641_v48 = vpop.f32.mrf.mxu1 }
 0x1d9   : > { %668 = vst [vmem:[%s1010_s16 + $0x78] sm:$0xff] %v650_v47  ;;  %v642_v49 = vadd.f32 %v751_v17, %v641_v48 }
 0x1db   : > { %666 = vst [vmem:[%s1010_s16 + $0x68] sm:$0xff] %v642_v49 }
 0x1dc PF: > { %s15_s18 = sadd.s32 1, %s896_s18  }
 0x1dd   : > { %p12_p4 = scmp.ge.s32.totalorder %s15_s18, 4  }
 0x1df   :  { %14 = sbr.rel (!%p12_p4) target bundleno = 1 (0x1), region = 70 }

// kernel: encoder_forward.4
= control target key start
LH: loop header
LB: loop body
LE: loop exit
PB: predicated region body
PF: predicated region fallthrough
CT: control target
= control target key end

     0   :  { %s1978_s27 = smov 0   ;;  %s1980_s28 = smov 0   ;;  %s2225_s0 = inlined_call_operand.vmem [shape: bf16[128,128], index: 0, kind: input, shape index: {}]   ;;  %s2226_s1 = inlined_call_operand.vmem [shape: bf16[128,128], index: 1, kind: input, shape index: {}]   ;;  %s2227_s2 = inlined_call_operand.vmem [shape: bf16[128,128], index: 2, kind: input, shape index: {}]   ;;  %s2228_s3 = inlined_call_operand.vmem [shape: f32[1,128], index: 3, kind: input, shape index: {}]   ;;  %s2229_s4 = inlined_call_operand.vmem [shape: bf16[128,128], index: 4, kind: input, shape index: {}]   ;;  %s2230_s5 = inlined_call_operand.vmem [shape: f32[1,128], index: 5, kind: input, shape index: {}]   ;;  %s2231_s6 = inlined_call_operand.vmem [shape: f32[8,128], index: 6, kind: input, shape index: {}]   ;;  %s2232_s7 = inlined_call_operand.vmem [shape: f32[128,128], index: 7, kind: output, shape index: {0}]   ;;  %s2233_s8 = inlined_call_operand.vmem [shape: f32[8,128], index: 8, kind: output, shape index: {1}]  }
   0x1   :  { %s1982_s29 = smov 0  }
   0x2 LB: > { %s31_s30 = sadd.s32 1, %s1924_s28  ;;  %p1386_p0 = scmp.ge.s32.totalorder %s1928_s29, 1  ;;  %s1928_s29 = sphi %s1982_s29, %s19_s29   ;;  %s1924_s28 = sphi %s1980_s28, %s2235_s28   ;;  %s1920_s27 = sphi %s1978_s27, %s2234_s27  }
   0x3   : > { %p33_p1 = scmp.ge.s32.totalorder %s31_s30, 2  ;;  %p282_p2 = scmp.lt.s32.totalorder %s1928_s29, 3 }
   0x5   : > { %s2237_s30 = smov (%p33_p1, %s31_s30), 0  ;;  %p283_p3 = pnand %p1386_p0, %p282_p2 }
   0x6   : > { %p337_p4 = scmp.eq.s32.totalorder (!%p283_p3), %s1920_s27, 0 }
   0x7   : > { %286 = sbr.rel (%p283_p3) target bundleno = 999 (0x3e7), region = 48 }
   0xc   : > { %342 = sbr.rel (!%p337_p4) target bundleno = 255 (0xff), region = 52  ;;  %v1866_v0 = vld [vmem:[%s2227_s2 + $0x38] sm:$0xff] (%p337_p4)   ;;  %v1867_v1 = vld [vmem:[%s2227_s2 + $0x30] sm:$0xff] (%p337_p4)   ;;  %v1868_v2 = vld [vmem:[%s2227_s2 + $0x28] sm:$0xff] (%p337_p4)  }
   0xd   : > { %1660 = vmatprep.subr.bf16.mxu0 (%p337_p4), %v1866_v0  ;;  %1791 = vmatprep.subr.bf16.mxu1 (%p337_p4), %v1866_v0  ;;  %v1869_v3 = vld [vmem:[%s2227_s2 + $0x20] sm:$0xff] (%p337_p4)   ;;  %v1870_v6 = vld [vmem:[%s2227_s2 + $0x18] sm:$0xff] (%p337_p4)   ;;  %v1871_v7 = vld [vmem:[%s2227_s2 + $0x10] sm:$0xff] (%p337_p4)  }
   0xe   : > { %1661 = vmatpush3.bf16.msra.mxu0 (%p337_p4), %v1866_v0  ;;  %1799 = vmatpush3.bf16.msra.mxu1 (%p337_p4), %v1866_v0  ;;  %v1874_v4 = vld [vmem:[%s2226_s1] sm:$0xff] (%p337_p4)   ;;  %v1872_v8 = vld [vmem:[%s2227_s2 + $0x8] sm:$0xff] (%p337_p4)   ;;  %v1878_v12 = vld [vmem:[%s2226_s1 + $0x10] sm:$0xff] (%p337_p4)  }
   0xf   : > { %1662 = vmatprep.subr.bf16.mxu0 (%p337_p4), %v1867_v1  ;;  %1792 = vmatprep.subr.bf16.mxu1 (%p337_p4), %v1867_v1  ;;  %v1875_v5 = vld [vmem:[%s2226_s1 + $0x20] sm:$0xff] (%p337_p4)   ;;  %v1876_v10 = vld [vmem:[%s2226_s1 + $0x8] sm:$0xff] (%p337_p4)   ;;  %v1879_v13 = vld [vmem:[%s2226_s1 + $0x30] sm:$0xff] (%p337_p4)  }
  0x10   : > { %1676 = vmatprep.mubr.bf16.mxu0 (%p337_p4), %v1874_v4  ;;  %1684 = vmatprep.mubr.bf16.mxu1 (%p337_p4), %v1875_v5  ;;  %v1873_v9 = vld [vmem:[%s2227_s2] sm:$0xff] (%p337_p4)   ;;  %v1877_v11 = vld [vmem:[%s2226_s1 + $0x28] sm:$0xff] (%p337_p4)   ;;  %v1880_v14 = vld [vmem:[%s2226_s1 + $0x18] sm:$0xff] (%p337_p4)  }
  0x11   : > { %v1881_v15 = vld [vmem:[%s2226_s1 + $0x38] sm:$0xff]  }
  0x12   : > { %1663 = vmatpush3.bf16.msra.mxu0 %v1867_v1  ;;  %1800 = vmatpush3.bf16.msra.mxu1 %v1867_v1 }
  0x13   : > { %1664 = vmatprep.subr.bf16.mxu0 %v1868_v2  ;;  %1793 = vmatprep.subr.bf16.mxu1 %v1868_v2 }
  0x16   : > { %1665 = vmatpush3.bf16.msra.mxu0 %v1868_v2  ;;  %1801 = vmatpush3.bf16.msra.mxu1 %v1868_v2 }
  0x17   : > { %1666 = vmatprep.subr.bf16.mxu0 %v1869_v3  ;;  %1794 = vmatprep.subr.bf16.mxu1 %v1869_v3 }
  0x1a   : > { %1667 = vmatpush3.bf16.msra.mxu0 %v1869_v3  ;;  %1802 = vmatpush3.bf16.msra.mxu1 %v1869_v3 }
  0x1b   : > { %1668 = vmatprep.subr.bf16.mxu0 %v1870_v6  ;;  %1795 = vmatprep.subr.bf16.mxu1 %v1870_v6 }
  0x1e   : > { %1669 = vmatpush3.bf16.msra.mxu0 %v1870_v6  ;;  %1803 = vmatpush3.bf16.msra.mxu1 %v1870_v6 }
  0x1f   : > { %1670 = vmatprep.subr.bf16.mxu0 %v1871_v7  ;;  %1796 = vmatprep.subr.bf16.mxu1 %v1871_v7 }
  0x22   : > { %1671 = vmatpush3.bf16.msra.mxu0 %v1871_v7  ;;  %1804 = vmatpush3.bf16.msra.mxu1 %v1871_v7 }
  0x23   : > { %1672 = vmatprep.subr.bf16.mxu0 %v1872_v8  ;;  %1797 = vmatprep.subr.bf16.mxu1 %v1872_v8 }
  0x26   : > { %1673 = vmatpush3.bf16.msra.mxu0 %v1872_v8  ;;  %1805 = vmatpush3.bf16.msra.mxu1 %v1872_v8 }
  0x27   : > { %1674 = vmatprep.subr.bf16.mxu0 %v1873_v9  ;;  %1798 = vmatprep.subr.bf16.mxu1 %v1873_v9 }
  0x2a   : > { %1675 = vmatpush3.bf16.msra.mxu0 %v1873_v9  ;;  %1806 = vmatpush3.bf16.msra.mxu1 %v1873_v9 }
  0x2d   : > { %1677 = vmatmul.mubr.bf16.vlgmr.msra.gmra.mxu0 %v1876_v10  ;;  %1685 = vmatmul.mubr.bf16.vlgmr.msra.gmra.mxu1 %v1877_v11 }
  0x2e   : > { %1680 = vmatprep.mubr.bf16.mxu0 %v1878_v12  ;;  %1688 = vmatprep.mubr.bf16.mxu1 %v1879_v13 }
  0x35   : > { %1681 = vmatmul.mubr.bf16.gmra.mxu0 %v1880_v14  ;;  %1689 = vmatmul.mubr.bf16.gmra.mxu1 %v1881_v15 }
  0xed   : > { %v1678_v16 = vpop.f32.mrf.mxu0  ;;  %v1686_v17 = vpop.f32.mrf.mxu1 }
  0xef   : > { %v505_v18 = vpop.f32.mrf.mxu0  ;;  %v537_v19 = vpop.f32.mrf.mxu1 }
  0xf1   : > { %v1679_v20 = vpop.f32.mrf.mxu0  ;;  %v1687_v21 = vpop.f32.mrf.mxu1 }
  0xf2   : > { %v1509_v22 = vpack.c.bf16 %v1679_v20, %v1678_v16  ;;  %v1529_v23 = vpack.c.bf16 %v1687_v21, %v1686_v17 }
  0xf3   : > { %v508_v24 = vpop.f32.mrf.mxu0  ;;  %v540_v25 = vpop.f32.mrf.mxu1 }
  0xf4   : > { %1581 = vst [vmem:[#allocation2 + $0x8] sm:$0xff] %v1509_v22   ;;  %1585 = vst [vmem:[#allocation2 + $0x28] sm:$0xff] %v1529_v23   ;;  %v1504_v26 = vpack.c.bf16 %v508_v24, %v505_v18  ;;  %v1524_v27 = vpack.c.bf16 %v540_v25, %v537_v19 }
  0xf5   : > { %v1682_v28 = vpop.f32.mrf.mxu0  ;;  %v1690_v29 = vpop.f32.mrf.mxu1 }
  0xf6   : > { %1505 = vst [vmem:[#allocation2] sm:$0xff] %v1504_v26   ;;  %1584 = vst [vmem:[#allocation2 + $0x20] sm:$0xff] %v1524_v27  }
  0xf7   : > { %v521_v30 = vpop.f32.mrf.mxu0  ;;  %v553_v31 = vpop.f32.mrf.mxu1 }
  0xf9   : > { %v1683_v32 = vpop.f32.mrf.mxu0  ;;  %v1691_v33 = vpop.f32.mrf.mxu1 }
  0xfa   : > { %v1519_v34 = vpack.c.bf16 %v1683_v32, %v1682_v28  ;;  %v1539_v35 = vpack.c.bf16 %v1691_v33, %v1690_v29 }
  0xfb   : > { %v524_v36 = vpop.f32.mrf.mxu0  ;;  %v556_v37 = vpop.f32.mrf.mxu1 }
  0xfc   : > { %1583 = vst [vmem:[#allocation2 + $0x18] sm:$0xff] %v1519_v34   ;;  %1587 = vst [vmem:[#allocation2 + $0x38] sm:$0xff] %v1539_v35   ;;  %v1514_v38 = vpack.c.bf16 %v524_v36, %v521_v30  ;;  %v1534_v39 = vpack.c.bf16 %v556_v37, %v553_v31 }
  0xfe   : > { %1582 = vst [vmem:[#allocation2 + $0x10] sm:$0xff] %v1514_v38   ;;  %1586 = vst [vmem:[#allocation2 + $0x30] sm:$0xff] %v1534_v39  }
  0xff PF: > { %p648_p5 = scmp.eq.s32.totalorder %s1920_s27, 1 }
 0x100   : > { %v1882_v40 = vld [vmem:[%s2229_s4 + $0x38] sm:$0xff] (%p648_p5)   ;;  %v1883_v41 = vld [vmem:[%s2229_s4 + $0x30] sm:$0xff] (%p648_p5)   ;;  %v1884_v42 = vld [vmem:[%s2229_s4 + $0x28] sm:$0xff] (%p648_p5)   ;;  %v1930_v8 = vmov (%p648_p5), 0.0  }
 0x101   : > { %652 = sbr.rel (!%p648_p5) target bundleno = 499 (0x1f3), region = 56  ;;  %1692 = vmatprep.subr.bf16.mxu0 (%p648_p5), %v1882_v40  ;;  %1807 = vmatprep.subr.bf16.mxu1 (%p648_p5), %v1882_v40  ;;  %v1885_v43 = vld [vmem:[%s2229_s4 + $0x20] sm:$0xff] (%p648_p5)   ;;  %v653_v44 = vld [vmem:[#allocation3 + $0x30] sm:$0xff] (%p648_p5)  ;;  %v1886_v50 = vld [vmem:[%s2229_s4 + $0x18] sm:$0xff] (%p648_p5)   ;;  %918 = vst [vmem:[#allocation4] sm:$0xff] (%p648_p5), %v1930_v8 }
 0x102   : > { %1693 = vmatpush3.bf16.msra.mxu0 (%p648_p5), %v1882_v40  ;;  %1815 = vmatpush3.bf16.msra.mxu1 (%p648_p5), %v1882_v40  ;;  %v654_v45 = vld [vmem:[#allocation3] sm:$0xff] (%p648_p5)  ;;  %v1887_v51 = vld [vmem:[%s2229_s4 + $0x10] sm:$0xff] (%p648_p5)   ;;  %v1888_v52 = vld [vmem:[%s2229_s4 + $0x8] sm:$0xff] (%p648_p5)  }
 0x103   : > { %1694 = vmatprep.subr.bf16.mxu0 (%p648_p5), %v1883_v41  ;;  %1808 = vmatprep.subr.bf16.mxu1 (%p648_p5), %v1883_v41  ;;  %v661_v46 = vld [vmem:[#allocation3 + $0x40] sm:$0xff] (%p648_p5)  ;;  %v669_v47 = vpack.c.bf16 (%p648_p5), %v654_v45, %v653_v44  ;;  %v655_v54 = vld [vmem:[#allocation3 + $0x58] sm:$0xff] (%p648_p5)  ;;  %v663_v56 = vld [vmem:[#allocation3 + $0x10] sm:$0xff] (%p648_p5) }
 0x104   : > { %v662_v48 = vld [vmem:[#allocation3 + $0x20] sm:$0xff] (%p648_p5)  ;;  %v656_v55 = vld [vmem:[#allocation3 + $0x18] sm:$0xff] (%p648_p5)  ;;  %v657_v58 = vld [vmem:[#allocation3 + $0x50] sm:$0xff] (%p648_p5) }
 0x105   : > { %v673_v49 = vpack.c.bf16 (%p648_p5), %v662_v48, %v661_v46  ;;  %1708 = vmatprep.mubr.bf16.mxu0 (%p648_p5), %v669_v47  ;;  %v1889_v53 = vld [vmem:[%s2229_s4] sm:$0xff] (%p648_p5)   ;;  %v664_v57 = vld [vmem:[#allocation3 + $0x38] sm:$0xff] (%p648_p5)  ;;  %v658_v59 = vld [vmem:[#allocation3 + $0x68] sm:$0xff] (%p648_p5)  ;;  %v670_v62 = vpack.c.bf16 (%p648_p5), %v656_v55, %v655_v54 }
 0x106   : > { %1695 = vmatpush3.bf16.msra.mxu0 %v1883_v41  ;;  %1816 = vmatpush3.bf16.msra.mxu1 %v1883_v41  ;;  %v665_v60 = vld [vmem:[#allocation3 + $0x60] sm:$0xff]  ;;  %v666_v61 = vld [vmem:[#allocation3 + $0x70] sm:$0xff]  ;;  %v674_v63 = vpack.c.bf16 %v664_v57, %v663_v56  ;;  %v671_v0 = vpack.c.bf16 %v658_v59, %v657_v58  ;;  %v659_v2 = vld [vmem:[#allocation3 + $0x8] sm:$0xff] }
 0x107   : > { %1696 = vmatprep.subr.bf16.mxu0 %v1884_v42  ;;  %1809 = vmatprep.subr.bf16.mxu1 %v1884_v42  ;;  %v675_v1 = vpack.c.bf16 %v666_v61, %v665_v60  ;;  %v660_v3 = vld [vmem:[#allocation3 + $0x48] sm:$0xff]  ;;  %v667_v4 = vld [vmem:[#allocation3 + $0x78] sm:$0xff] }
 0x108   : > { %1716 = vmatprep.mubr.bf16.mxu1 %v673_v49  ;;  %v668_v5 = vld [vmem:[#allocation3 + $0x28] sm:$0xff]  ;;  %v672_v6 = vpack.c.bf16 %v660_v3, %v659_v2 }
 0x109   : > { %v676_v7 = vpack.c.bf16 %v668_v5, %v667_v4 }
 0x10a   : > { %1697 = vmatpush3.bf16.msra.mxu0 %v1884_v42  ;;  %1817 = vmatpush3.bf16.msra.mxu1 %v1884_v42 }
 0x10b   : > { %1698 = vmatprep.subr.bf16.mxu0 %v1885_v43  ;;  %1810 = vmatprep.subr.bf16.mxu1 %v1885_v43 }
 0x10e   : > { %1699 = vmatpush3.bf16.msra.mxu0 %v1885_v43  ;;  %1818 = vmatpush3.bf16.msra.mxu1 %v1885_v43 }
 0x10f   : > { %1700 = vmatprep.subr.bf16.mxu0 %v1886_v50  ;;  %1811 = vmatprep.subr.bf16.mxu1 %v1886_v50 }
 0x112   : > { %1701 = vmatpush3.bf16.msra.mxu0 %v1886_v50  ;;  %1819 = vmatpush3.bf16.msra.mxu1 %v1886_v50 }
 0x113   : > { %1702 = vmatprep.subr.bf16.mxu0 %v1887_v51  ;;  %1812 = vmatprep.subr.bf16.mxu1 %v1887_v51 }
 0x116   : > { %1703 = vmatpush3.bf16.msra.mxu0 %v1887_v51  ;;  %1820 = vmatpush3.bf16.msra.mxu1 %v1887_v51 }
 0x117   : > { %1704 = vmatprep.subr.bf16.mxu0 %v1888_v52  ;;  %1813 = vmatprep.subr.bf16.mxu1 %v1888_v52 }
 0x11a   : > { %1705 = vmatpush3.bf16.msra.mxu0 %v1888_v52  ;;  %1821 = vmatpush3.bf16.msra.mxu1 %v1888_v52 }
 0x11b   : > { %1706 = vmatprep.subr.bf16.mxu0 %v1889_v53  ;;  %1814 = vmatprep.subr.bf16.mxu1 %v1889_v53 }
 0x11e   : > { %1707 = vmatpush3.bf16.msra.mxu0 %v1889_v53  ;;  %1822 = vmatpush3.bf16.msra.mxu1 %v1889_v53 }
 0x121   : > { %1709 = vmatmul.mubr.bf16.vlgmr.msra.gmra.mxu0 %v670_v62  ;;  %1717 = vmatmul.mubr.bf16.vlgmr.msra.gmra.mxu1 %v674_v63 }
 0x122   : > { %1712 = vmatprep.mubr.bf16.mxu0 %v671_v0  ;;  %1720 = vmatprep.mubr.bf16.mxu1 %v675_v1 }
 0x129   : > { %1713 = vmatmul.mubr.bf16.gmra.mxu0 %v672_v6  ;;  %1721 = vmatmul.mubr.bf16.gmra.mxu1 %v676_v7 }
 0x1e1   : > { %v1710_v9 = vpop.f32.mrf.mxu0  ;;  %v1718_v10 = vpop.f32.mrf.mxu1 }
 0x1e3   : > { %v775_v11 = vpop.f32.mrf.mxu0  ;;  %v807_v12 = vpop.f32.mrf.mxu1 }
 0x1e5   : > { %v1711_v13 = vpop.f32.mrf.mxu0  ;;  %v1719_v14 = vpop.f32.mrf.mxu1 }
 0x1e6   : > { %v1549_v15 = vpack.c.bf16 %v1711_v13, %v1710_v9  ;;  %v1569_v16 = vpack.c.bf16 %v1719_v14, %v1718_v10 }
 0x1e7   : > { %v778_v17 = vpop.f32.mrf.mxu0  ;;  %v810_v18 = vpop.f32.mrf.mxu1 }
 0x1e8   : > { %1588 = vst [vmem:[#allocation2 + $0x8] sm:$0xff] %v1549_v15   ;;  %1592 = vst [vmem:[#allocation2 + $0x28] sm:$0xff] %v1569_v16   ;;  %v1544_v19 = vpack.c.bf16 %v778_v17, %v775_v11  ;;  %v1564_v20 = vpack.c.bf16 %v810_v18, %v807_v12 }
 0x1e9   : > { %v1714_v21 = vpop.f32.mrf.mxu0  ;;  %v1722_v22 = vpop.f32.mrf.mxu1 }
 0x1ea   : > { %1545 = vst [vmem:[#allocation2] sm:$0xff] %v1544_v19   ;;  %1591 = vst [vmem:[#allocation2 + $0x20] sm:$0xff] %v1564_v20  }
 0x1eb   : > { %v791_v23 = vpop.f32.mrf.mxu0  ;;  %v823_v24 = vpop.f32.mrf.mxu1 }
 0x1ed   : > { %v1715_v25 = vpop.f32.mrf.mxu0  ;;  %v1723_v26 = vpop.f32.mrf.mxu1 }
 0x1ee   : > { %v1559_v27 = vpack.c.bf16 %v1715_v25, %v1714_v21  ;;  %v1579_v28 = vpack.c.bf16 %v1723_v26, %v1722_v22 }
 0x1ef   : > { %v794_v29 = vpop.f32.mrf.mxu0  ;;  %v826_v30 = vpop.f32.mrf.mxu1 }
 0x1f0   : > { %1590 = vst [vmem:[#allocation2 + $0x18] sm:$0xff] %v1559_v27   ;;  %1594 = vst [vmem:[#allocation2 + $0x38] sm:$0xff] %v1579_v28   ;;  %v1554_v31 = vpack.c.bf16 %v794_v29, %v791_v23  ;;  %v1574_v32 = vpack.c.bf16 %v826_v30, %v823_v24 }
 0x1f2   : > { %1589 = vst [vmem:[#allocation2 + $0x10] sm:$0xff] %v1554_v31   ;;  %1593 = vst [vmem:[#allocation2 + $0x30] sm:$0xff] %v1574_v32  }
 0x1f3 PF: > { %v1892_v35 = vld [vmem:[#allocation2 + $0x28] sm:$0xff]   ;;  %v1893_v36 = vld [vmem:[#allocation2 + $0x20] sm:$0xff]   ;;  %v1902_v45 = vld [vmem:[%s2225_s0 + $0x10] sm:$0xff]   ;;  %s919_s19 = scalar_select %p337_p4, 1, 0  ;;  %v962_v49 = vlaneseq }
 0x1f4   : > { %v1898_v37 = vld [vmem:[%s2225_s0] sm:$0xff]   ;;  %v1896_v41 = vld [vmem:[#allocation2 + $0x8] sm:$0xff]   ;;  %v1903_v46 = vld [vmem:[%s2225_s0 + $0x30] sm:$0xff]   ;;  %p1461_p6 = scmp.ne.s32.totalorder %s1920_s27, 0 }
 0x1f5   : > { %v1899_v38 = vld [vmem:[%s2225_s0 + $0x20] sm:$0xff]   ;;  %1740 = vmatprep.mubr.bf16.mxu0 %v1898_v37  ;;  %v1900_v43 = vld [vmem:[%s2225_s0 + $0x8] sm:$0xff]   ;;  %v1904_v47 = vld [vmem:[%s2225_s0 + $0x18] sm:$0xff]   ;;  %s920_s20 = scvt.s32.f32 %s919_s19  ;;  %v963_v56 = vshrl.u32 %v962_v49, 7 }
 0x1f6   : > { %1748 = vmatprep.mubr.bf16.mxu1 %v1899_v38  ;;  %v1897_v42 = vld [vmem:[#allocation2] sm:$0xff]   ;;  %v1901_v44 = vld [vmem:[%s2225_s0 + $0x28] sm:$0xff]   ;;  %v1905_v48 = vld [vmem:[%s2225_s0 + $0x38] sm:$0xff]  }
 0x1f7   : > { %v1890_v33 = vld [vmem:[#allocation2 + $0x38] sm:$0xff]   ;;  %s924_s21 = ssub.f32 1.0, %s920_s20  ;;  %v921_v50 = vld [vmem:[%s2228_s3] sm:$0x1]  ;;  %v922_v51 = vstv %s920_s20  ;;  %v964_v58 = vsub.s32 0, %v963_v56 }
 0x1f8   : > { %1724 = vmatprep.subr.bf16.mxu0 %v1890_v33  ;;  %1823 = vmatprep.subr.bf16.mxu1 %v1890_v33  ;;  %v1894_v39 = vld [vmem:[#allocation2 + $0x18] sm:$0xff]   ;;  %v925_v52 = vld [vmem:[%s2230_s5] sm:$0x1]  ;;  %v923_v54 = vmul.f32 %v922_v51, %v921_v50 }
 0x1f9   : > { %v1891_v34 = vld [vmem:[#allocation2 + $0x30] sm:$0xff]   ;;  %1725 = vmatpush3.bf16.msra.mxu0 %v1890_v33  ;;  %1831 = vmatpush3.bf16.msra.mxu1 %v1890_v33  ;;  %v926_v53 = vstv %s924_s21 }
 0x1fa   : > { %1726 = vmatprep.subr.bf16.mxu0 %v1891_v34  ;;  %1824 = vmatprep.subr.bf16.mxu1 %v1891_v34  ;;  %v1895_v40 = vld [vmem:[#allocation2 + $0x10] sm:$0xff]   ;;  %v927_v55 = vmul.f32 %v926_v53, %v925_v52 }
 0x1fc   : > { %v928_v57 = vadd.f32 %v927_v55, %v923_v54 }
 0x1fd   : > { %1727 = vmatpush3.bf16.msra.mxu0 %v1891_v34  ;;  %1832 = vmatpush3.bf16.msra.mxu1 %v1891_v34 }
 0x1fe   : > { %1728 = vmatprep.subr.bf16.mxu0 %v1892_v35  ;;  %1825 = vmatprep.subr.bf16.mxu1 %v1892_v35  ;;  %v965_v59 = vrot.slane %v928_v57, %v964_v58 }
 0x201   : > { %1729 = vmatpush3.bf16.msra.mxu0 %v1892_v35  ;;  %1833 = vmatpush3.bf16.msra.mxu1 %v1892_v35 }
 0x202   : > { %1730 = vmatprep.subr.bf16.mxu0 %v1893_v36  ;;  %1826 = vmatprep.subr.bf16.mxu1 %v1893_v36 }
 0x205   : > { %1731 = vmatpush3.bf16.msra.mxu0 %v1893_v36  ;;  %1834 = vmatpush3.bf16.msra.mxu1 %v1893_v36 }
 0x206   : > { %1732 = vmatprep.subr.bf16.mxu0 %v1894_v39  ;;  %1827 = vmatprep.subr.bf16.mxu1 %v1894_v39 }
 0x209   : > { %1733 = vmatpush3.bf16.msra.mxu0 %v1894_v39  ;;  %1835 = vmatpush3.bf16.msra.mxu1 %v1894_v39 }
 0x20a   : > { %1734 = vmatprep.subr.bf16.mxu0 %v1895_v40  ;;  %1828 = vmatprep.subr.bf16.mxu1 %v1895_v40 }
 0x20d   : > { %1735 = vmatpush3.bf16.msra.mxu0 %v1895_v40  ;;  %1836 = vmatpush3.bf16.msra.mxu1 %v1895_v40 }
 0x20e   : > { %1736 = vmatprep.subr.bf16.mxu0 %v1896_v41  ;;  %1829 = vmatprep.subr.bf16.mxu1 %v1896_v41 }
 0x211   : > { %1737 = vmatpush3.bf16.msra.mxu0 %v1896_v41  ;;  %1837 = vmatpush3.bf16.msra.mxu1 %v1896_v41 }
 0x212   : > { %1738 = vmatprep.subr.bf16.mxu0 %v1897_v42  ;;  %1830 = vmatprep.subr.bf16.mxu1 %v1897_v42 }
 0x215   : > { %1739 = vmatpush3.bf16.msra.mxu0 %v1897_v42  ;;  %1838 = vmatpush3.bf16.msra.mxu1 %v1897_v42 }
 0x218   : > { %1741 = vmatmul.mubr.bf16.vlgmr.msra.gmra.mxu0 %v1900_v43  ;;  %1749 = vmatmul.mubr.bf16.vlgmr.msra.gmra.mxu1 %v1901_v44 }
 0x219   : > { %1744 = vmatprep.mubr.bf16.mxu0 %v1902_v45  ;;  %1752 = vmatprep.mubr.bf16.mxu1 %v1903_v46 }
 0x220   : > { %1745 = vmatmul.mubr.bf16.gmra.mxu0 %v1904_v47  ;;  %1753 = vmatmul.mubr.bf16.gmra.mxu1 %v1905_v48 }
 0x2d8   : > { %v1742_v60 = vpop.f32.mrf.mxu0  ;;  %v1750_v61 = vpop.f32.mrf.mxu1 }
 0x2d9   : > { %v1106_v62 = vadd.f32 %v1742_v60, %v965_v59  ;;  %v1138_v63 = vadd.f32 %v1750_v61, %v965_v59 }
 0x2da   : > { %v1097_v0 = vpop.f32.mrf.mxu0  ;;  %v1129_v1 = vpop.f32.mrf.mxu1 }
 0x2db   : > { %v2108_v2 = vmax.f32 %v1106_v62, 0.0  ;;  %v2110_v3 = vmax.f32 %v1138_v63, 0.0  ;;  %v1098_v4 = vadd.f32 %v1097_v0, %v965_v59  ;;  %v1130_v5 = vadd.f32 %v1129_v1, %v965_v59 }
 0x2dc   : > { %v1743_v6 = vpop.f32.mrf.mxu0  ;;  %v1751_v7 = vpop.f32.mrf.mxu1 }
 0x2dd   : > { %v2112_v8 = vmax.f32 %v1098_v4, 0.0  ;;  %v2114_v9 = vmax.f32 %v1130_v5, 0.0  ;;  %v1109_v10 = vadd.f32 %v1743_v6, %v965_v59  ;;  %v1141_v11 = vadd.f32 %v1751_v7, %v965_v59 }
 0x2de   : > { %v1100_v12 = vpop.f32.mrf.mxu0  ;;  %v1132_v13 = vpop.f32.mrf.mxu1 }
 0x2df   : > { %v2116_v14 = vmax.f32 %v1109_v10, 0.0  ;;  %v2118_v15 = vmax.f32 %v1141_v11, 0.0  ;;  %v1101_v16 = vadd.f32 %v1100_v12, %v965_v59  ;;  %v1133_v17 = vadd.f32 %v1132_v13, %v965_v59 }
 0x2e0   : > { %v1746_v18 = vpop.f32.mrf.mxu0  ;;  %v1754_v19 = vpop.f32.mrf.mxu1 }
 0x2e1   : > { %v2120_v20 = vmax.f32 %v1101_v16, 0.0  ;;  %v2122_v21 = vmax.f32 %v1133_v17, 0.0  ;;  %v1122_v22 = vadd.f32 %v1746_v18, %v965_v59  ;;  %v1154_v23 = vadd.f32 %v1754_v19, %v965_v59 }
 0x2e2   : > { %v1113_v24 = vpop.f32.mrf.mxu0  ;;  %v1145_v25 = vpop.f32.mrf.mxu1 }
 0x2e3   : > { %v2124_v26 = vmax.f32 %v1122_v22, 0.0  ;;  %v1174_v27 = vmax.f32 %v1154_v23, 0.0  ;;  %v1114_v28 = vadd.f32 %v1113_v24, %v965_v59  ;;  %v1146_v29 = vadd.f32 %v1145_v25, %v965_v59 }
 0x2e4   : > { %v1747_v30 = vpop.f32.mrf.mxu0  ;;  %v1755_v31 = vpop.f32.mrf.mxu1 }
 0x2e5   : > { %v2126_v32 = vmax.f32 %v1114_v28, 0.0  ;;  %v1172_v33 = vmax.f32 %v1146_v29, 0.0  ;;  %v1125_v34 = vadd.f32 %v1747_v30, %v965_v59  ;;  %v1157_v35 = vadd.f32 %v1755_v31, %v965_v59  ;;  %1178 = sbr.rel (%p1461_p6) target bundleno = 754 (0x2f2), region = 60 }
 0x2e6   : > { %v1116_v36 = vpop.f32.mrf.mxu0  ;;  %v1148_v37 = vpop.f32.mrf.mxu1 }
 0x2e7   : > { %v1167_v38 = vmax.f32 %v1125_v34, 0.0  ;;  %v1175_v39 = vmax.f32 %v1157_v35, 0.0  ;;  %v1117_v40 = vadd.f32 %v1116_v36, %v965_v59  ;;  %v1149_v41 = vadd.f32 %v1148_v37, %v965_v59 }
 0x2e9   : > { %v1165_v42 = vmax.f32 %v1117_v40, 0.0  ;;  %v1173_v43 = vmax.f32 %v1149_v41, 0.0 }
 0x2ea   : > { %1181 = vst [vmem:[#allocation3 + $0x30] sm:$0xff] %v2112_v8  ;;  %1182 = vst [vmem:[#allocation3] sm:$0xff] %v2120_v20 }
 0x2eb   : > { %1183 = vst [vmem:[#allocation3 + $0x58] sm:$0xff] %v2108_v2  ;;  %1184 = vst [vmem:[#allocation3 + $0x18] sm:$0xff] %v2116_v14 }
 0x2ec   : > { %1185 = vst [vmem:[#allocation3 + $0x50] sm:$0xff] %v2126_v32  ;;  %1186 = vst [vmem:[#allocation3 + $0x68] sm:$0xff] %v1165_v42 }
 0x2ed   : > { %1187 = vst [vmem:[#allocation3 + $0x8] sm:$0xff] %v2124_v26  ;;  %1188 = vst [vmem:[#allocation3 + $0x48] sm:$0xff] %v1167_v38 }
 0x2ee   : > { %1189 = vst [vmem:[#allocation3 + $0x40] sm:$0xff] %v2114_v9  ;;  %1190 = vst [vmem:[#allocation3 + $0x20] sm:$0xff] %v2122_v21 }
 0x2ef   : > { %1191 = vst [vmem:[#allocation3 + $0x10] sm:$0xff] %v2110_v3  ;;  %1192 = vst [vmem:[#allocation3 + $0x38] sm:$0xff] %v2118_v15 }
 0x2f0   : > { %1193 = vst [vmem:[#allocation3 + $0x60] sm:$0xff] %v1172_v33  ;;  %1194 = vst [vmem:[#allocation3 + $0x70] sm:$0xff] %v1173_v43 }
 0x2f1   : > { %1195 = vst [vmem:[#allocation3 + $0x78] sm:$0xff] %v1174_v27  ;;  %1196 = vst [vmem:[#allocation3 + $0x28] sm:$0xff] %v1175_v39 }
 0x2f2 PF: > { %1197 = vst [vmem:[%s2232_s7] sm:$0xff] %v2112_v8  ;;  %1198 = vst [vmem:[%s2232_s7 + $0x8] sm:$0xff] %v2120_v20  ;;  %p1462_p7 = scmp.ne.s32.totalorder %s1920_s27, 1 }
 0x2f3   : > { %1199 = vst [vmem:[%s2232_s7 + $0x10] sm:$0xff] %v2108_v2  ;;  %1200 = vst [vmem:[%s2232_s7 + $0x18] sm:$0xff] %v2116_v14 }
 0x2f4   : > { %1201 = vst [vmem:[%s2232_s7 + $0x20] sm:$0xff] %v2126_v32  ;;  %1202 = vst [vmem:[%s2232_s7 + $0x28] sm:$0xff] %v1165_v42 }
 0x2f5   : > { %1203 = vst [vmem:[%s2232_s7 + $0x30] sm:$0xff] %v2124_v26  ;;  %1204 = vst [vmem:[%s2232_s7 + $0x38] sm:$0xff] %v1167_v38  ;;  %1215 = sbr.rel (%p1462_p7) target bundleno = 991 (0x3df), region = 64 }
 0x2f6   : > { %1205 = vst [vmem:[%s2232_s7 + $0x40] sm:$0xff] %v2114_v9  ;;  %1206 = vst [vmem:[%s2232_s7 + $0x48] sm:$0xff] %v2122_v21 }
 0x2f7   : > { %1207 = vst [vmem:[%s2232_s7 + $0x50] sm:$0xff] %v2110_v3  ;;  %1208 = vst [vmem:[%s2232_s7 + $0x58] sm:$0xff] %v2118_v15 }
 0x2f8   : > { %1209 = vst [vmem:[%s2232_s7 + $0x60] sm:$0xff] %v1172_v33  ;;  %1210 = vst [vmem:[%s2232_s7 + $0x68] sm:$0xff] %v1173_v43 }
 0x2f9   : > { %1211 = vst [vmem:[%s2232_s7 + $0x70] sm:$0xff] %v1174_v27  ;;  %1212 = vst [vmem:[%s2232_s7 + $0x78] sm:$0xff] %v1175_v39 }
 0x2fa   : > { %v1931_v44 = vmov 0.0   ;;  %vm1932_vm0 = vmmov 0   ;;  %v1217_v45 = vld [vmem:[%s2231_s6] sm:$0xff] }
 0x2fb   : > { %1756 = vmatprep.subr.mxu0 %v1931_v44  ;;  %1788 = vmatprep.mubr.msk.f32.mxu0 %vm1932_vm0, %v1931_v44  ;;  %v1216_v46 = vld [vmem:[#allocation4] sm:$0xff] }
 0x2fc   : > { %1757 = vmatpush3.msra.mxu0 %v1175_v39 }
 0x2fd   : > { %1758 = vmatprep.subr.mxu0 %v1931_v44 }
 0x2fe   : > { %1759 = vmatpush3.msra.mxu0 %v1174_v27 }
 0x2ff   : > { %1760 = vmatprep.subr.mxu0 %v1931_v44 }
 0x300   : > { %1761 = vmatpush3.msra.mxu0 %v1173_v43 }
 0x301   : > { %1762 = vmatprep.subr.mxu0 %v1931_v44 }
 0x302   : > { %1763 = vmatpush3.msra.mxu0 %v1172_v33 }
 0x303   : > { %1764 = vmatprep.subr.mxu0 %v1931_v44 }
 0x304   : > { %1765 = vmatpush3.msra.mxu0 %v2118_v15 }
 0x305   : > { %1766 = vmatprep.subr.mxu0 %v1931_v44 }
 0x306   : > { %1767 = vmatpush3.msra.mxu0 %v2110_v3 }
 0x307   : > { %1768 = vmatprep.subr.mxu0 %v1931_v44 }
 0x308   : > { %1769 = vmatpush3.msra.mxu0 %v2122_v21 }
 0x309   : > { %1770 = vmatprep.subr.mxu0 %v1931_v44 }
 0x30a   : > { %1771 = vmatpush3.msra.mxu0 %v2114_v9 }
 0x30b   : > { %1772 = vmatprep.subr.mxu0 %v1931_v44 }
 0x30c   : > { %1773 = vmatpush3.msra.mxu0 %v1167_v38 }
 0x30d   : > { %1774 = vmatprep.subr.mxu0 %v1931_v44 }
 0x30e   : > { %1775 = vmatpush3.msra.mxu0 %v2124_v26 }
 0x30f   : > { %1776 = vmatprep.subr.mxu0 %v1931_v44 }
 0x310   : > { %1777 = vmatpush3.msra.mxu0 %v1165_v42 }
 0x311   : > { %1778 = vmatprep.subr.mxu0 %v1931_v44 }
 0x312   : > { %1779 = vmatpush3.msra.mxu0 %v2126_v32 }
 0x313   : > { %1780 = vmatprep.subr.mxu0 %v1931_v44 }
 0x314   : > { %1781 = vmatpush3.msra.mxu0 %v2116_v14 }
 0x315   : > { %1782 = vmatprep.subr.mxu0 %v1931_v44 }
 0x316   : > { %1783 = vmatpush3.msra.mxu0 %v2108_v2 }
 0x317   : > { %1784 = vmatprep.subr.mxu0 %v1931_v44 }
 0x318   : > { %1785 = vmatpush3.msra.mxu0 %v2120_v20 }
 0x319   : > { %1786 = vmatprep.subr.mxu0 %v1931_v44 }
 0x31a   : > { %1787 = vmatpush3.msra.mxu0 %v2112_v8 }
 0x31b   : > { %1789 = vmatmul.mubr.f32.vlgmr.msra.gmra.mxu0 %v1217_v45 }
 0x3db   : > { %v1284_v47 = vpop.f32.mrf.mxu0 }
 0x3dc   : > { %v1288_v48 = vadd.f32 %v1284_v47, %v1216_v46 }
 0x3dd   : > { %v1790_v49 = vpop.f32.mrf.mxu0 }
 0x3de   : > { %1289 = vst [vmem:[#allocation4] sm:$0xff] %v1288_v48 }
 0x3df PF: > { %1291 = sbr.rel (!%p648_p5) target bundleno = 999 (0x3e7), region = 68 }
 0x3e5   : > { %v1292_v50 = vld [vmem:[#allocation4] sm:$0xff] }
 0x3e6   : > { %1293 = vst [vmem:[%s2233_s8] sm:$0xff] %v1292_v50 }
 0x3e7 PF: > { %s19_s29 = sadd.s32 1, %s1928_s29   ;;  %s2234_s27 = smov %s1924_s28 }
 0x3e8   : > { %p16_p8 = scmp.ge.s32.totalorder %s19_s29, 4   ;;  %s2235_s28 = smov %s2237_s30 }
 0x3ea   :  { %18 = sbr.rel (!%p16_p8) target bundleno = 2 (0x2), region = 110 }

</bundles_post_ra>
